<compile_context>
chip_gen: v7x
topology: tpu7x:2x2x1
jax: 0.10.0
libtpu: 0.0.40
codegen_flags: <defaults>
</compile_context>

<pallas_src>
import functools

import jax
import jax.numpy as jnp
from jax.experimental import pallas as pl
from jax.experimental.pallas import tpu as pltpu


def seq2seq_kernel(tf_flags_ref,   # SMEM (target_len,) int32 teacher-forcing flags
                   x_ref,          # VMEM (T, B, F)
                   tgt_ref,        # VMEM (target_len, B, F)
                   wih_e_ref,      # VMEM (F, 4H)  encoder Wih^T, gate order [i,f,o,g]
                   whh_e_ref,      # VMEM (H, 4H)  encoder Whh^T
                   b_e_ref,        # VMEM (1, 4H)  encoder b_ih + b_hh
                   wih_d_ref,      # VMEM (F, 4H)  decoder Wih^T
                   b_d_ref,        # VMEM (1, 4H)  decoder b_ih + b_hh
                   wcat_d_ref,     # VMEM (H, 8H+F) [Whh_d^T | Wlin^T@Wih_d^T | Wlin^T]
                   b_fb_ref,       # VMEM (1, 4H)  b_lin @ Wih_d^T + b_d (composed feedback bias)
                   b_lin_ref,      # VMEM (1, F)   decoder Linear bias
                   out_ref):       # VMEM (target_len, B, F)
    T, B, F = x_ref.shape
    L = out_ref.shape[0]
    H = whh_e_ref.shape[0]
    G = 4 * H

    # ---- parameters into vreg-resident locals; broadcasts hoisted once ------
    wih_e = wih_e_ref[...]
    whh_e = whh_e_ref[...]
    wih_d = wih_d_ref[...]
    wcat_d = wcat_d_ref[...]
    b_e = jnp.broadcast_to(b_e_ref[...], (B, G))
    b_d = jnp.broadcast_to(b_d_ref[...], (B, G))
    b_fb = jnp.broadcast_to(b_fb_ref[...], (B, G))
    b_lin = jnp.broadcast_to(b_lin_ref[...], (B, F))

    # ---- input projections: independent of h/c, OFF the serial chain --------
    xproj = [jnp.dot(x_ref[t], wih_e, preferred_element_type=jnp.float32) + b_e
             for t in range(T)]
    tgt_proj = [jnp.dot(tgt_ref[t], wih_d, preferred_element_type=jnp.float32) + b_d
                for t in range(L)]
    dec0_proj = (jnp.dot(x_ref[T - 1], wih_d, preferred_element_type=jnp.float32)
                 + b_d)

    def cell(gates, c):
        # gate layout [i, f, o, g]: one sigmoid over 3H lanes, one tanh over H.
        s = jax.nn.sigmoid(gates[:, :3 * H])
        g = jnp.tanh(gates[:, 3 * H:])
        i = s[:, 0 * H:1 * H]
        f = s[:, 1 * H:2 * H]
        o = s[:, 2 * H:3 * H]
        c_new = f * c + i * g
        h_new = o * jnp.tanh(c_new)
        return h_new, c_new

    # zero initial hidden/cell state (PyTorch default when hx is None),
    # carried purely in registers.
    h = jnp.zeros((B, H), jnp.float32)
    c = jnp.zeros((B, H), jnp.float32)

    # ---- encoder: fully unrolled; only the K=H dot is serially dependent ----
    for t in range(T):
        gates = xproj[t] + jnp.dot(h, whh_e, preferred_element_type=jnp.float32)
        h, c = cell(gates, c)

    # ---- decoder: ONE fused h-dependent dot per step -------------------------
    # fused[:, 0:4H]    = h @ Whh_d^T            (next-step gate contribution)
    # fused[:, 4H:8H]   = h @ (Wlin^T @ Wih_d^T) (composed feedback projection)
    # fused[:, 8H:8H+F] = h @ Wlin^T             (Linear pre-activation)
    fused = jnp.dot(h, wcat_d, preferred_element_type=jnp.float32)
    in_proj = dec0_proj
    outs = []
    for t in range(L):
        gates = in_proj + fused[:, :G]
        h, c = cell(gates, c)
        fused = jnp.dot(h, wcat_d, preferred_element_type=jnp.float32)
        out = fused[:, 2 * G:2 * G + F] + b_lin      # Linear(h) -> (B, F)
        outs.append(out)
        out_proj = fused[:, G:2 * G] + b_fb          # == (out @ Wih_d^T + b_d)
        use_tf = tf_flags_ref[t]
        in_proj = jnp.where(use_tf == 1, tgt_proj[t], out_proj)

    # single batched, lane-dense store after the loop (no per-step masked
    # stores interleaved into the dependence chain).
    out_ref[...] = jnp.stack(outs, axis=0)


def _reorder_gates(w, H):
    """Permute gate columns from PyTorch [i, f, g, o] to [i, f, o, g]."""
    return jnp.concatenate(
        [w[..., :2 * H], w[..., 3 * H:4 * H], w[..., 2 * H:3 * H]], axis=-1)


def seq2seq_forward(inputs, targets, params, target_len, tf_flags):
    """inputs: (B, T, F), targets: (B, target_len, F) -> (B, target_len, 1)."""
    B, T, F = inputs.shape
    H = params["whh_e_T"].shape[0]

    x_tm = jnp.transpose(inputs, (1, 0, 2))          # (T, B, F) time-major
    tgt_tm = jnp.transpose(targets, (1, 0, 2))       # (target_len, B, F)

    # ---- weight prep (runs once; constant-foldable under jit) ---------------
    wih_e = _reorder_gates(params["wih_e_T"], H)     # (F, 4H)
    whh_e = _reorder_gates(params["whh_e_T"], H)     # (H, 4H)
    b_e = _reorder_gates(params["b_e"], H)           # (1, 4H)
    wih_d = _reorder_gates(params["wih_d_T"], H)     # (F, 4H)
    whh_d = _reorder_gates(params["whh_d_T"], H)     # (H, 4H)
    b_d = _reorder_gates(params["b_d"], H)           # (1, 4H)
    wlin = params["wlin_T"]                          # (H, F)
    blin = params["blin"]                            # (1, F)

    # Composed feedback projection: out @ Wih_d^T + b_d
    #   = (h @ Wlin^T + b_lin) @ Wih_d^T + b_d = h @ (Wlin^T @ Wih_d^T) + b_fb
    w_comp = wlin @ wih_d                            # (H, 4H)
    b_fb = blin @ wih_d + b_d                        # (1, 4H)
    # Lane-aligned fused decoder weight: slices start at lanes 0, 4H, 8H.
    w_cat_d = jnp.concatenate([whh_d, w_comp, wlin], axis=1)   # (H, 8H+F)

    vmem = pl.BlockSpec(memory_space=pltpu.MemorySpace.VMEM)
    smem = pl.BlockSpec(memory_space=pltpu.MemorySpace.SMEM)

    out_tm = pl.pallas_call(
        seq2seq_kernel,
        out_shape=jax.ShapeDtypeStruct((target_len, B, F), jnp.float32),
        in_specs=[smem] + [vmem] * 10,
        out_specs=vmem,
    )(tf_flags, x_tm, tgt_tm, wih_e, whh_e, b_e, wih_d, b_d, w_cat_d, b_fb, blin)

    # outputs[:, t, :] = out[:, -1].unsqueeze(-1): extract the last feature in
    # the wrapper so the kernel's store stays lane-dense.
    return jnp.transpose(out_tm[:, :, F - 1:F], (1, 0, 2))   # (B, target_len, 1)


# --------------------------- pure-JAX reference ------------------------------
def seq2seq_reference(inputs, targets, params, target_len, tf_flags):
    B, T, F = inputs.shape
    H = params["whh_e_T"].shape[0]

    def step(x, h, c, wih_t, whh_t, b):
        g = x @ wih_t + h @ whh_t + b
        i = jax.nn.sigmoid(g[:, 0:H]); f = jax.nn.sigmoid(g[:, H:2 * H])
        gg = jnp.tanh(g[:, 2 * H:3 * H]); o = jax.nn.sigmoid(g[:, 3 * H:4 * H])
        c2 = f * c + i * gg
        return o * jnp.tanh(c2), c2

    h = jnp.zeros((B, H), jnp.float32)
    c = jnp.zeros((B, H), jnp.float32)
    for t in range(T):
        h, c = step(inputs[:, t, :], h, c,
                    params["wih_e_T"], params["whh_e_T"], params["b_e"])
    dec_in = inputs[:, -1, :]
    outs = []
    for t in range(target_len):
        h, c = step(dec_in, h, c,
                    params["wih_d_T"], params["whh_d_T"], params["b_d"])
        out = h @ params["wlin_T"] + params["blin"]
        dec_in = jnp.where(tf_flags[t] == 1, targets[:, t, :], out)
        outs.append(out[:, -1:])
    return jnp.stack(outs, axis=1)                   # (B, target_len, 1)


# ------------------------------- main ----------------------------------------
if __name__ == "__main__":
    batch = 2
    seq_len = 8
    input_size = 8
    hidden_size = 16
    target_len = 4
    teacher_forcing_ratio = 0.5

    key = jax.random.PRNGKey(0)
    ks = jax.random.split(key, 14)
    bound = 1.0 / jnp.sqrt(hidden_size)

    def unif(k, shape):
        return jax.random.uniform(k, shape, jnp.float32, -bound, bound)

    # nn.LSTM parameters (stored pre-transposed, PyTorch gate order [i,f,g,o])
    # plus combined biases; the wrapper fuses / reorders / composes them.
    params = {
        "wih_e_T": unif(ks[0], (input_size, 4 * hidden_size)),
        "whh_e_T": unif(ks[1], (hidden_size, 4 * hidden_size)),
        "b_e": (unif(ks[2], (1, 4 * hidden_size))
                + unif(ks[3], (1, 4 * hidden_size))),
        "wih_d_T": unif(ks[4], (input_size, 4 * hidden_size)),
        "whh_d_T": unif(ks[5], (hidden_size, 4 * hidden_size)),
        "b_d": (unif(ks[6], (1, 4 * hidden_size))
                + unif(ks[7], (1, 4 * hidden_size))),
        "wlin_T": unif(ks[8], (hidden_size, input_size)),
        "blin": unif(ks[9], (1, input_size)),
    }

    inputs = jax.random.normal(ks[10], (batch, seq_len, input_size), jnp.float32)
    targets = jax.random.normal(ks[11], (batch, target_len, input_size),
                                jnp.float32)

    # Deterministic replacement for python random.random() < teacher_forcing_ratio
    # (one independent coin flip per decoder step).
    tf_flags = (jax.random.uniform(ks[12], (target_len,))
                < teacher_forcing_ratio).astype(jnp.int32)

    run = jax.jit(functools.partial(seq2seq_forward, target_len=target_len))
    out = run(inputs, targets, params, tf_flags=tf_flags)
    jax.block_until_ready(out)

    ref = seq2seq_reference(inputs, targets, params, target_len, tf_flags)
    assert out.shape == (batch, target_len, 1)
    assert jnp.allclose(out, ref, atol=1e-4), "kernel mismatch vs JAX reference"

    # TODO(synk): training-side code (DataLoader / optimizer) in the original
    # file has no kernel equivalent and is intentionally omitted.
    print("KERNEL_OK")
</pallas_src>

<mosaic_0001>
module attributes {stable_mosaic.version = 11 : i64} {
  func.func @seq2seq_kernel(%arg0: memref<4xi32, #tpu.memory_space<smem>>, %arg1: memref<8x2x8xf32, #tpu.memory_space<vmem>>, %arg2: memref<4x2x8xf32, #tpu.memory_space<vmem>>, %arg3: memref<8x64xf32, #tpu.memory_space<vmem>>, %arg4: memref<16x64xf32, #tpu.memory_space<vmem>>, %arg5: memref<1x64xf32, #tpu.memory_space<vmem>>, %arg6: memref<8x64xf32, #tpu.memory_space<vmem>>, %arg7: memref<1x64xf32, #tpu.memory_space<vmem>>, %arg8: memref<16x136xf32, #tpu.memory_space<vmem>>, %arg9: memref<1x64xf32, #tpu.memory_space<vmem>>, %arg10: memref<1x8xf32, #tpu.memory_space<vmem>>, %arg11: memref<4x2x8xf32, #tpu.memory_space<vmem>>) attributes {dimension_semantics = [], scalar_prefetch = 0 : i64, scratch_operands = 0 : i64, tpu.core_type = #tpu.core_type<tc>} {
    %c0 = arith.constant 0 : index
    %c0_0 = arith.constant 0 : index
    %0 = vector.load %arg3[%c0, %c0_0] : memref<8x64xf32, #tpu.memory_space<vmem>>, vector<8x64xf32>
    %c0_1 = arith.constant 0 : index
    %c0_2 = arith.constant 0 : index
    %1 = vector.load %arg4[%c0_1, %c0_2] : memref<16x64xf32, #tpu.memory_space<vmem>>, vector<16x64xf32>
    %c0_3 = arith.constant 0 : index
    %c0_4 = arith.constant 0 : index
    %2 = vector.load %arg6[%c0_3, %c0_4] : memref<8x64xf32, #tpu.memory_space<vmem>>, vector<8x64xf32>
    %c0_5 = arith.constant 0 : index
    %c0_6 = arith.constant 0 : index
    %3 = vector.load %arg8[%c0_5, %c0_6] : memref<16x136xf32, #tpu.memory_space<vmem>>, vector<16x136xf32>
    %c0_7 = arith.constant 0 : index
    %c0_8 = arith.constant 0 : index
    %4 = vector.load %arg5[%c0_7, %c0_8] : memref<1x64xf32, #tpu.memory_space<vmem>>, vector<1x64xf32>
    %5 = vector.shape_cast %4 : vector<1x64xf32> to vector<1x64xf32>
    %6 = vector.broadcast %5 : vector<1x64xf32> to vector<2x64xf32>
    %c0_9 = arith.constant 0 : index
    %c0_10 = arith.constant 0 : index
    %7 = vector.load %arg7[%c0_9, %c0_10] : memref<1x64xf32, #tpu.memory_space<vmem>>, vector<1x64xf32>
    %8 = vector.shape_cast %7 : vector<1x64xf32> to vector<1x64xf32>
    %9 = vector.broadcast %8 : vector<1x64xf32> to vector<2x64xf32>
    %c0_11 = arith.constant 0 : index
    %c0_12 = arith.constant 0 : index
    %10 = vector.load %arg9[%c0_11, %c0_12] : memref<1x64xf32, #tpu.memory_space<vmem>>, vector<1x64xf32>
    %11 = vector.shape_cast %10 : vector<1x64xf32> to vector<1x64xf32>
    %12 = vector.broadcast %11 : vector<1x64xf32> to vector<2x64xf32>
    %c0_13 = arith.constant 0 : index
    %c0_14 = arith.constant 0 : index
    %13 = vector.load %arg10[%c0_13, %c0_14] : memref<1x8xf32, #tpu.memory_space<vmem>>, vector<1x8xf32>
    %14 = vector.shape_cast %13 : vector<1x8xf32> to vector<1x8xf32>
    %15 = vector.broadcast %14 : vector<1x8xf32> to vector<2x8xf32>
    %c0_15 = arith.constant 0 : index
    %c0_16 = arith.constant 0 : index
    %c0_17 = arith.constant 0 : index
    %16 = vector.load %arg1[%c0_15, %c0_16, %c0_17] : memref<8x2x8xf32, #tpu.memory_space<vmem>>, vector<1x2x8xf32>
    %17 = vector.shape_cast %16 : vector<1x2x8xf32> to vector<2x8xf32>
    %cst = arith.constant dense<0.000000e+00> : vector<2x64xf32>
    %18 = tpu.matmul %17, %0, %cst {dimension_numbers = #tpu.dot_dimension_numbers<[1], [0], [0], [1], [0, 0, 1, 1], [], []>} : vector<2x8xf32>, vector<8x64xf32>, vector<2x64xf32> -> vector<2x64xf32>
    %19 = arith.addf %18, %6 : vector<2x64xf32>
    %c1 = arith.constant 1 : index
    %c0_18 = arith.constant 0 : index
    %c0_19 = arith.constant 0 : index
    %20 = vector.load %arg1[%c1, %c0_18, %c0_19] : memref<8x2x8xf32, #tpu.memory_space<vmem>>, vector<1x2x8xf32>
    %21 = vector.shape_cast %20 : vector<1x2x8xf32> to vector<2x8xf32>
    %cst_20 = arith.constant dense<0.000000e+00> : vector<2x64xf32>
    %22 = tpu.matmul %21, %0, %cst_20 {dimension_numbers = #tpu.dot_dimension_numbers<[1], [0], [0], [1], [0, 0, 1, 1], [], []>} : vector<2x8xf32>, vector<8x64xf32>, vector<2x64xf32> -> vector<2x64xf32>
    %23 = arith.addf %22, %6 : vector<2x64xf32>
    %c2 = arith.constant 2 : index
    %c0_21 = arith.constant 0 : index
    %c0_22 = arith.constant 0 : index
    %24 = vector.load %arg1[%c2, %c0_21, %c0_22] : memref<8x2x8xf32, #tpu.memory_space<vmem>>, vector<1x2x8xf32>
    %25 = vector.shape_cast %24 : vector<1x2x8xf32> to vector<2x8xf32>
    %cst_23 = arith.constant dense<0.000000e+00> : vector<2x64xf32>
    %26 = tpu.matmul %25, %0, %cst_23 {dimension_numbers = #tpu.dot_dimension_numbers<[1], [0], [0], [1], [0, 0, 1, 1], [], []>} : vector<2x8xf32>, vector<8x64xf32>, vector<2x64xf32> -> vector<2x64xf32>
    %27 = arith.addf %26, %6 : vector<2x64xf32>
    %c3 = arith.constant 3 : index
    %c0_24 = arith.constant 0 : index
    %c0_25 = arith.constant 0 : index
    %28 = vector.load %arg1[%c3, %c0_24, %c0_25] : memref<8x2x8xf32, #tpu.memory_space<vmem>>, vector<1x2x8xf32>
    %29 = vector.shape_cast %28 : vector<1x2x8xf32> to vector<2x8xf32>
    %cst_26 = arith.constant dense<0.000000e+00> : vector<2x64xf32>
    %30 = tpu.matmul %29, %0, %cst_26 {dimension_numbers = #tpu.dot_dimension_numbers<[1], [0], [0], [1], [0, 0, 1, 1], [], []>} : vector<2x8xf32>, vector<8x64xf32>, vector<2x64xf32> -> vector<2x64xf32>
    %31 = arith.addf %30, %6 : vector<2x64xf32>
    %c4 = arith.constant 4 : index
    %c0_27 = arith.constant 0 : index
    %c0_28 = arith.constant 0 : index
    %32 = vector.load %arg1[%c4, %c0_27, %c0_28] : memref<8x2x8xf32, #tpu.memory_space<vmem>>, vector<1x2x8xf32>
    %33 = vector.shape_cast %32 : vector<1x2x8xf32> to vector<2x8xf32>
    %cst_29 = arith.constant dense<0.000000e+00> : vector<2x64xf32>
    %34 = tpu.matmul %33, %0, %cst_29 {dimension_numbers = #tpu.dot_dimension_numbers<[1], [0], [0], [1], [0, 0, 1, 1], [], []>} : vector<2x8xf32>, vector<8x64xf32>, vector<2x64xf32> -> vector<2x64xf32>
    %35 = arith.addf %34, %6 : vector<2x64xf32>
    %c5 = arith.constant 5 : index
    %c0_30 = arith.constant 0 : index
    %c0_31 = arith.constant 0 : index
    %36 = vector.load %arg1[%c5, %c0_30, %c0_31] : memref<8x2x8xf32, #tpu.memory_space<vmem>>, vector<1x2x8xf32>
    %37 = vector.shape_cast %36 : vector<1x2x8xf32> to vector<2x8xf32>
    %cst_32 = arith.constant dense<0.000000e+00> : vector<2x64xf32>
    %38 = tpu.matmul %37, %0, %cst_32 {dimension_numbers = #tpu.dot_dimension_numbers<[1], [0], [0], [1], [0, 0, 1, 1], [], []>} : vector<2x8xf32>, vector<8x64xf32>, vector<2x64xf32> -> vector<2x64xf32>
    %39 = arith.addf %38, %6 : vector<2x64xf32>
    %c6 = arith.constant 6 : index
    %c0_33 = arith.constant 0 : index
    %c0_34 = arith.constant 0 : index
    %40 = vector.load %arg1[%c6, %c0_33, %c0_34] : memref<8x2x8xf32, #tpu.memory_space<vmem>>, vector<1x2x8xf32>
    %41 = vector.shape_cast %40 : vector<1x2x8xf32> to vector<2x8xf32>
    %cst_35 = arith.constant dense<0.000000e+00> : vector<2x64xf32>
    %42 = tpu.matmul %41, %0, %cst_35 {dimension_numbers = #tpu.dot_dimension_numbers<[1], [0], [0], [1], [0, 0, 1, 1], [], []>} : vector<2x8xf32>, vector<8x64xf32>, vector<2x64xf32> -> vector<2x64xf32>
    %43 = arith.addf %42, %6 : vector<2x64xf32>
    %c7 = arith.constant 7 : index
    %c0_36 = arith.constant 0 : index
    %c0_37 = arith.constant 0 : index
    %44 = vector.load %arg1[%c7, %c0_36, %c0_37] : memref<8x2x8xf32, #tpu.memory_space<vmem>>, vector<1x2x8xf32>
    %45 = vector.shape_cast %44 : vector<1x2x8xf32> to vector<2x8xf32>
    %cst_38 = arith.constant dense<0.000000e+00> : vector<2x64xf32>
    %46 = tpu.matmul %45, %0, %cst_38 {dimension_numbers = #tpu.dot_dimension_numbers<[1], [0], [0], [1], [0, 0, 1, 1], [], []>} : vector<2x8xf32>, vector<8x64xf32>, vector<2x64xf32> -> vector<2x64xf32>
    %47 = arith.addf %46, %6 : vector<2x64xf32>
    %c0_39 = arith.constant 0 : index
    %c0_40 = arith.constant 0 : index
    %c0_41 = arith.constant 0 : index
    %48 = vector.load %arg2[%c0_39, %c0_40, %c0_41] : memref<4x2x8xf32, #tpu.memory_space<vmem>>, vector<1x2x8xf32>
    %49 = vector.shape_cast %48 : vector<1x2x8xf32> to vector<2x8xf32>
    %cst_42 = arith.constant dense<0.000000e+00> : vector<2x64xf32>
    %50 = tpu.matmul %49, %2, %cst_42 {dimension_numbers = #tpu.dot_dimension_numbers<[1], [0], [0], [1], [0, 0, 1, 1], [], []>} : vector<2x8xf32>, vector<8x64xf32>, vector<2x64xf32> -> vector<2x64xf32>
    %51 = arith.addf %50, %9 : vector<2x64xf32>
    %c1_43 = arith.constant 1 : index
    %c0_44 = arith.constant 0 : index
    %c0_45 = arith.constant 0 : index
    %52 = vector.load %arg2[%c1_43, %c0_44, %c0_45] : memref<4x2x8xf32, #tpu.memory_space<vmem>>, vector<1x2x8xf32>
    %53 = vector.shape_cast %52 : vector<1x2x8xf32> to vector<2x8xf32>
    %cst_46 = arith.constant dense<0.000000e+00> : vector<2x64xf32>
    %54 = tpu.matmul %53, %2, %cst_46 {dimension_numbers = #tpu.dot_dimension_numbers<[1], [0], [0], [1], [0, 0, 1, 1], [], []>} : vector<2x8xf32>, vector<8x64xf32>, vector<2x64xf32> -> vector<2x64xf32>
    %55 = arith.addf %54, %9 : vector<2x64xf32>
    %c2_47 = arith.constant 2 : index
    %c0_48 = arith.constant 0 : index
    %c0_49 = arith.constant 0 : index
    %56 = vector.load %arg2[%c2_47, %c0_48, %c0_49] : memref<4x2x8xf32, #tpu.memory_space<vmem>>, vector<1x2x8xf32>
    %57 = vector.shape_cast %56 : vector<1x2x8xf32> to vector<2x8xf32>
    %cst_50 = arith.constant dense<0.000000e+00> : vector<2x64xf32>
    %58 = tpu.matmul %57, %2, %cst_50 {dimension_numbers = #tpu.dot_dimension_numbers<[1], [0], [0], [1], [0, 0, 1, 1], [], []>} : vector<2x8xf32>, vector<8x64xf32>, vector<2x64xf32> -> vector<2x64xf32>
    %59 = arith.addf %58, %9 : vector<2x64xf32>
    %c7_51 = arith.constant 7 : index
    %c0_52 = arith.constant 0 : index
    %c0_53 = arith.constant 0 : index
    %60 = vector.load %arg1[%c7_51, %c0_52, %c0_53] : memref<8x2x8xf32, #tpu.memory_space<vmem>>, vector<1x2x8xf32>
    %61 = vector.shape_cast %60 : vector<1x2x8xf32> to vector<2x8xf32>
    %cst_54 = arith.constant dense<0.000000e+00> : vector<2x64xf32>
    %62 = tpu.matmul %61, %2, %cst_54 {dimension_numbers = #tpu.dot_dimension_numbers<[1], [0], [0], [1], [0, 0, 1, 1], [], []>} : vector<2x8xf32>, vector<8x64xf32>, vector<2x64xf32> -> vector<2x64xf32>
    %63 = arith.addf %62, %9 : vector<2x64xf32>
    %cst_55 = arith.constant 0.000000e+00 : f32
    %64 = vector.broadcast %cst_55 : f32 to vector<2x16xf32>
    %cst_56 = arith.constant 0.000000e+00 : f32
    %65 = vector.broadcast %cst_56 : f32 to vector<2x16xf32>
    %cst_57 = arith.constant dense<0.000000e+00> : vector<2x64xf32>
    %66 = tpu.matmul %64, %1, %cst_57 {dimension_numbers = #tpu.dot_dimension_numbers<[1], [0], [0], [1], [0, 0, 1, 1], [], []>} : vector<2x16xf32>, vector<16x64xf32>, vector<2x64xf32> -> vector<2x64xf32>
    %67 = arith.addf %19, %66 : vector<2x64xf32>
    %68 = vector.extract_strided_slice %67 {offsets = [0, 0], sizes = [2, 48], strides = [1, 1]} : vector<2x64xf32> to vector<2x48xf32>
    %69 = arith.negf %68 : vector<2x48xf32>
    %70 = math.exp %69 : vector<2x48xf32>
    %cst_58 = arith.constant 1.000000e+00 : f32
    %71 = vector.broadcast %cst_58 : f32 to vector<2x48xf32>
    %72 = arith.addf %71, %70 : vector<2x48xf32>
    %73 = arith.divf %71, %72 : vector<2x48xf32>
    %74 = vector.extract_strided_slice %67 {offsets = [0, 48], sizes = [2, 16], strides = [1, 1]} : vector<2x64xf32> to vector<2x16xf32>
    %75 = math.tanh %74 : vector<2x16xf32>
    %76 = vector.extract_strided_slice %73 {offsets = [0, 0], sizes = [2, 16], strides = [1, 1]} : vector<2x48xf32> to vector<2x16xf32>
    %77 = vector.extract_strided_slice %73 {offsets = [0, 16], sizes = [2, 16], strides = [1, 1]} : vector<2x48xf32> to vector<2x16xf32>
    %78 = vector.extract_strided_slice %73 {offsets = [0, 32], sizes = [2, 16], strides = [1, 1]} : vector<2x48xf32> to vector<2x16xf32>
    %79 = arith.mulf %77, %65 : vector<2x16xf32>
    %80 = arith.mulf %76, %75 : vector<2x16xf32>
    %81 = arith.addf %79, %80 : vector<2x16xf32>
    %82 = math.tanh %81 : vector<2x16xf32>
    %83 = arith.mulf %78, %82 : vector<2x16xf32>
    %cst_59 = arith.constant dense<0.000000e+00> : vector<2x64xf32>
    %84 = tpu.matmul %83, %1, %cst_59 {dimension_numbers = #tpu.dot_dimension_numbers<[1], [0], [0], [1], [0, 0, 1, 1], [], []>} : vector<2x16xf32>, vector<16x64xf32>, vector<2x64xf32> -> vector<2x64xf32>
    %85 = arith.addf %23, %84 : vector<2x64xf32>
    %86 = vector.extract_strided_slice %85 {offsets = [0, 0], sizes = [2, 48], strides = [1, 1]} : vector<2x64xf32> to vector<2x48xf32>
    %87 = arith.negf %86 : vector<2x48xf32>
    %88 = math.exp %87 : vector<2x48xf32>
    %cst_60 = arith.constant 1.000000e+00 : f32
    %89 = vector.broadcast %cst_60 : f32 to vector<2x48xf32>
    %90 = arith.addf %89, %88 : vector<2x48xf32>
    %91 = arith.divf %89, %90 : vector<2x48xf32>
    %92 = vector.extract_strided_slice %85 {offsets = [0, 48], sizes = [2, 16], strides = [1, 1]} : vector<2x64xf32> to vector<2x16xf32>
    %93 = math.tanh %92 : vector<2x16xf32>
    %94 = vector.extract_strided_slice %91 {offsets = [0, 0], sizes = [2, 16], strides = [1, 1]} : vector<2x48xf32> to vector<2x16xf32>
    %95 = vector.extract_strided_slice %91 {offsets = [0, 16], sizes = [2, 16], strides = [1, 1]} : vector<2x48xf32> to vector<2x16xf32>
    %96 = vector.extract_strided_slice %91 {offsets = [0, 32], sizes = [2, 16], strides = [1, 1]} : vector<2x48xf32> to vector<2x16xf32>
    %97 = arith.mulf %95, %81 : vector<2x16xf32>
    %98 = arith.mulf %94, %93 : vector<2x16xf32>
    %99 = arith.addf %97, %98 : vector<2x16xf32>
    %100 = math.tanh %99 : vector<2x16xf32>
    %101 = arith.mulf %96, %100 : vector<2x16xf32>
    %cst_61 = arith.constant dense<0.000000e+00> : vector<2x64xf32>
    %102 = tpu.matmul %101, %1, %cst_61 {dimension_numbers = #tpu.dot_dimension_numbers<[1], [0], [0], [1], [0, 0, 1, 1], [], []>} : vector<2x16xf32>, vector<16x64xf32>, vector<2x64xf32> -> vector<2x64xf32>
    %103 = arith.addf %27, %102 : vector<2x64xf32>
    %104 = vector.extract_strided_slice %103 {offsets = [0, 0], sizes = [2, 48], strides = [1, 1]} : vector<2x64xf32> to vector<2x48xf32>
    %105 = arith.negf %104 : vector<2x48xf32>
    %106 = math.exp %105 : vector<2x48xf32>
    %cst_62 = arith.constant 1.000000e+00 : f32
    %107 = vector.broadcast %cst_62 : f32 to vector<2x48xf32>
    %108 = arith.addf %107, %106 : vector<2x48xf32>
    %109 = arith.divf %107, %108 : vector<2x48xf32>
    %110 = vector.extract_strided_slice %103 {offsets = [0, 48], sizes = [2, 16], strides = [1, 1]} : vector<2x64xf32> to vector<2x16xf32>
    %111 = math.tanh %110 : vector<2x16xf32>
    %112 = vector.extract_strided_slice %109 {offsets = [0, 0], sizes = [2, 16], strides = [1, 1]} : vector<2x48xf32> to vector<2x16xf32>
    %113 = vector.extract_strided_slice %109 {offsets = [0, 16], sizes = [2, 16], strides = [1, 1]} : vector<2x48xf32> to vector<2x16xf32>
    %114 = vector.extract_strided_slice %109 {offsets = [0, 32], sizes = [2, 16], strides = [1, 1]} : vector<2x48xf32> to vector<2x16xf32>
    %115 = arith.mulf %113, %99 : vector<2x16xf32>
    %116 = arith.mulf %112, %111 : vector<2x16xf32>
    %117 = arith.addf %115, %116 : vector<2x16xf32>
    %118 = math.tanh %117 : vector<2x16xf32>
    %119 = arith.mulf %114, %118 : vector<2x16xf32>
    %cst_63 = arith.constant dense<0.000000e+00> : vector<2x64xf32>
    %120 = tpu.matmul %119, %1, %cst_63 {dimension_numbers = #tpu.dot_dimension_numbers<[1], [0], [0], [1], [0, 0, 1, 1], [], []>} : vector<2x16xf32>, vector<16x64xf32>, vector<2x64xf32> -> vector<2x64xf32>
    %121 = arith.addf %31, %120 : vector<2x64xf32>
    %122 = vector.extract_strided_slice %121 {offsets = [0, 0], sizes = [2, 48], strides = [1, 1]} : vector<2x64xf32> to vector<2x48xf32>
    %123 = arith.negf %122 : vector<2x48xf32>
    %124 = math.exp %123 : vector<2x48xf32>
    %cst_64 = arith.constant 1.000000e+00 : f32
    %125 = vector.broadcast %cst_64 : f32 to vector<2x48xf32>
    %126 = arith.addf %125, %124 : vector<2x48xf32>
    %127 = arith.divf %125, %126 : vector<2x48xf32>
    %128 = vector.extract_strided_slice %121 {offsets = [0, 48], sizes = [2, 16], strides = [1, 1]} : vector<2x64xf32> to vector<2x16xf32>
    %129 = math.tanh %128 : vector<2x16xf32>
    %130 = vector.extract_strided_slice %127 {offsets = [0, 0], sizes = [2, 16], strides = [1, 1]} : vector<2x48xf32> to vector<2x16xf32>
    %131 = vector.extract_strided_slice %127 {offsets = [0, 16], sizes = [2, 16], strides = [1, 1]} : vector<2x48xf32> to vector<2x16xf32>
    %132 = vector.extract_strided_slice %127 {offsets = [0, 32], sizes = [2, 16], strides = [1, 1]} : vector<2x48xf32> to vector<2x16xf32>
    %133 = arith.mulf %131, %117 : vector<2x16xf32>
    %134 = arith.mulf %130, %129 : vector<2x16xf32>
    %135 = arith.addf %133, %134 : vector<2x16xf32>
    %136 = math.tanh %135 : vector<2x16xf32>
    %137 = arith.mulf %132, %136 : vector<2x16xf32>
    %cst_65 = arith.constant dense<0.000000e+00> : vector<2x64xf32>
    %138 = tpu.matmul %137, %1, %cst_65 {dimension_numbers = #tpu.dot_dimension_numbers<[1], [0], [0], [1], [0, 0, 1, 1], [], []>} : vector<2x16xf32>, vector<16x64xf32>, vector<2x64xf32> -> vector<2x64xf32>
    %139 = arith.addf %35, %138 : vector<2x64xf32>
    %140 = vector.extract_strided_slice %139 {offsets = [0, 0], sizes = [2, 48], strides = [1, 1]} : vector<2x64xf32> to vector<2x48xf32>
    %141 = arith.negf %140 : vector<2x48xf32>
    %142 = math.exp %141 : vector<2x48xf32>
    %cst_66 = arith.constant 1.000000e+00 : f32
    %143 = vector.broadcast %cst_66 : f32 to vector<2x48xf32>
    %144 = arith.addf %143, %142 : vector<2x48xf32>
    %145 = arith.divf %143, %144 : vector<2x48xf32>
    %146 = vector.extract_strided_slice %139 {offsets = [0, 48], sizes = [2, 16], strides = [1, 1]} : vector<2x64xf32> to vector<2x16xf32>
    %147 = math.tanh %146 : vector<2x16xf32>
    %148 = vector.extract_strided_slice %145 {offsets = [0, 0], sizes = [2, 16], strides = [1, 1]} : vector<2x48xf32> to vector<2x16xf32>
    %149 = vector.extract_strided_slice %145 {offsets = [0, 16], sizes = [2, 16], strides = [1, 1]} : vector<2x48xf32> to vector<2x16xf32>
    %150 = vector.extract_strided_slice %145 {offsets = [0, 32], sizes = [2, 16], strides = [1, 1]} : vector<2x48xf32> to vector<2x16xf32>
    %151 = arith.mulf %149, %135 : vector<2x16xf32>
    %152 = arith.mulf %148, %147 : vector<2x16xf32>
    %153 = arith.addf %151, %152 : vector<2x16xf32>
    %154 = math.tanh %153 : vector<2x16xf32>
    %155 = arith.mulf %150, %154 : vector<2x16xf32>
    %cst_67 = arith.constant dense<0.000000e+00> : vector<2x64xf32>
    %156 = tpu.matmul %155, %1, %cst_67 {dimension_numbers = #tpu.dot_dimension_numbers<[1], [0], [0], [1], [0, 0, 1, 1], [], []>} : vector<2x16xf32>, vector<16x64xf32>, vector<2x64xf32> -> vector<2x64xf32>
    %157 = arith.addf %39, %156 : vector<2x64xf32>
    %158 = vector.extract_strided_slice %157 {offsets = [0, 0], sizes = [2, 48], strides = [1, 1]} : vector<2x64xf32> to vector<2x48xf32>
    %159 = arith.negf %158 : vector<2x48xf32>
    %160 = math.exp %159 : vector<2x48xf32>
    %cst_68 = arith.constant 1.000000e+00 : f32
    %161 = vector.broadcast %cst_68 : f32 to vector<2x48xf32>
    %162 = arith.addf %161, %160 : vector<2x48xf32>
    %163 = arith.divf %161, %162 : vector<2x48xf32>
    %164 = vector.extract_strided_slice %157 {offsets = [0, 48], sizes = [2, 16], strides = [1, 1]} : vector<2x64xf32> to vector<2x16xf32>
    %165 = math.tanh %164 : vector<2x16xf32>
    %166 = vector.extract_strided_slice %163 {offsets = [0, 0], sizes = [2, 16], strides = [1, 1]} : vector<2x48xf32> to vector<2x16xf32>
    %167 = vector.extract_strided_slice %163 {offsets = [0, 16], sizes = [2, 16], strides = [1, 1]} : vector<2x48xf32> to vector<2x16xf32>
    %168 = vector.extract_strided_slice %163 {offsets = [0, 32], sizes = [2, 16], strides = [1, 1]} : vector<2x48xf32> to vector<2x16xf32>
    %169 = arith.mulf %167, %153 : vector<2x16xf32>
    %170 = arith.mulf %166, %165 : vector<2x16xf32>
    %171 = arith.addf %169, %170 : vector<2x16xf32>
    %172 = math.tanh %171 : vector<2x16xf32>
    %173 = arith.mulf %168, %172 : vector<2x16xf32>
    %cst_69 = arith.constant dense<0.000000e+00> : vector<2x64xf32>
    %174 = tpu.matmul %173, %1, %cst_69 {dimension_numbers = #tpu.dot_dimension_numbers<[1], [0], [0], [1], [0, 0, 1, 1], [], []>} : vector<2x16xf32>, vector<16x64xf32>, vector<2x64xf32> -> vector<2x64xf32>
    %175 = arith.addf %43, %174 : vector<2x64xf32>
    %176 = vector.extract_strided_slice %175 {offsets = [0, 0], sizes = [2, 48], strides = [1, 1]} : vector<2x64xf32> to vector<2x48xf32>
    %177 = arith.negf %176 : vector<2x48xf32>
    %178 = math.exp %177 : vector<2x48xf32>
    %cst_70 = arith.constant 1.000000e+00 : f32
    %179 = vector.broadcast %cst_70 : f32 to vector<2x48xf32>
    %180 = arith.addf %179, %178 : vector<2x48xf32>
    %181 = arith.divf %179, %180 : vector<2x48xf32>
    %182 = vector.extract_strided_slice %175 {offsets = [0, 48], sizes = [2, 16], strides = [1, 1]} : vector<2x64xf32> to vector<2x16xf32>
    %183 = math.tanh %182 : vector<2x16xf32>
    %184 = vector.extract_strided_slice %181 {offsets = [0, 0], sizes = [2, 16], strides = [1, 1]} : vector<2x48xf32> to vector<2x16xf32>
    %185 = vector.extract_strided_slice %181 {offsets = [0, 16], sizes = [2, 16], strides = [1, 1]} : vector<2x48xf32> to vector<2x16xf32>
    %186 = vector.extract_strided_slice %181 {offsets = [0, 32], sizes = [2, 16], strides = [1, 1]} : vector<2x48xf32> to vector<2x16xf32>
    %187 = arith.mulf %185, %171 : vector<2x16xf32>
    %188 = arith.mulf %184, %183 : vector<2x16xf32>
    %189 = arith.addf %187, %188 : vector<2x16xf32>
    %190 = math.tanh %189 : vector<2x16xf32>
    %191 = arith.mulf %186, %190 : vector<2x16xf32>
    %cst_71 = arith.constant dense<0.000000e+00> : vector<2x64xf32>
    %192 = tpu.matmul %191, %1, %cst_71 {dimension_numbers = #tpu.dot_dimension_numbers<[1], [0], [0], [1], [0, 0, 1, 1], [], []>} : vector<2x16xf32>, vector<16x64xf32>, vector<2x64xf32> -> vector<2x64xf32>
    %193 = arith.addf %47, %192 : vector<2x64xf32>
    %194 = vector.extract_strided_slice %193 {offsets = [0, 0], sizes = [2, 48], strides = [1, 1]} : vector<2x64xf32> to vector<2x48xf32>
    %195 = arith.negf %194 : vector<2x48xf32>
    %196 = math.exp %195 : vector<2x48xf32>
    %cst_72 = arith.constant 1.000000e+00 : f32
    %197 = vector.broadcast %cst_72 : f32 to vector<2x48xf32>
    %198 = arith.addf %197, %196 : vector<2x48xf32>
    %199 = arith.divf %197, %198 : vector<2x48xf32>
    %200 = vector.extract_strided_slice %193 {offsets = [0, 48], sizes = [2, 16], strides = [1, 1]} : vector<2x64xf32> to vector<2x16xf32>
    %201 = math.tanh %200 : vector<2x16xf32>
    %202 = vector.extract_strided_slice %199 {offsets = [0, 0], sizes = [2, 16], strides = [1, 1]} : vector<2x48xf32> to vector<2x16xf32>
    %203 = vector.extract_strided_slice %199 {offsets = [0, 16], sizes = [2, 16], strides = [1, 1]} : vector<2x48xf32> to vector<2x16xf32>
    %204 = vector.extract_strided_slice %199 {offsets = [0, 32], sizes = [2, 16], strides = [1, 1]} : vector<2x48xf32> to vector<2x16xf32>
    %205 = arith.mulf %203, %189 : vector<2x16xf32>
    %206 = arith.mulf %202, %201 : vector<2x16xf32>
    %207 = arith.addf %205, %206 : vector<2x16xf32>
    %208 = math.tanh %207 : vector<2x16xf32>
    %209 = arith.mulf %204, %208 : vector<2x16xf32>
    %cst_73 = arith.constant dense<0.000000e+00> : vector<2x136xf32>
    %210 = tpu.matmul %209, %3, %cst_73 {dimension_numbers = #tpu.dot_dimension_numbers<[1], [0], [0], [1], [0, 0, 1, 1], [], []>} : vector<2x16xf32>, vector<16x136xf32>, vector<2x136xf32> -> vector<2x136xf32>
    %211 = vector.extract_strided_slice %210 {offsets = [0, 0], sizes = [2, 64], strides = [1, 1]} : vector<2x136xf32> to vector<2x64xf32>
    %212 = arith.addf %63, %211 : vector<2x64xf32>
    %213 = vector.extract_strided_slice %212 {offsets = [0, 0], sizes = [2, 48], strides = [1, 1]} : vector<2x64xf32> to vector<2x48xf32>
    %214 = arith.negf %213 : vector<2x48xf32>
    %215 = math.exp %214 : vector<2x48xf32>
    %cst_74 = arith.constant 1.000000e+00 : f32
    %216 = vector.broadcast %cst_74 : f32 to vector<2x48xf32>
    %217 = arith.addf %216, %215 : vector<2x48xf32>
    %218 = arith.divf %216, %217 : vector<2x48xf32>
    %219 = vector.extract_strided_slice %212 {offsets = [0, 48], sizes = [2, 16], strides = [1, 1]} : vector<2x64xf32> to vector<2x16xf32>
    %220 = math.tanh %219 : vector<2x16xf32>
    %221 = vector.extract_strided_slice %218 {offsets = [0, 0], sizes = [2, 16], strides = [1, 1]} : vector<2x48xf32> to vector<2x16xf32>
    %222 = vector.extract_strided_slice %218 {offsets = [0, 16], sizes = [2, 16], strides = [1, 1]} : vector<2x48xf32> to vector<2x16xf32>
    %223 = vector.extract_strided_slice %218 {offsets = [0, 32], sizes = [2, 16], strides = [1, 1]} : vector<2x48xf32> to vector<2x16xf32>
    %224 = arith.mulf %222, %207 : vector<2x16xf32>
    %225 = arith.mulf %221, %220 : vector<2x16xf32>
    %226 = arith.addf %224, %225 : vector<2x16xf32>
    %227 = math.tanh %226 : vector<2x16xf32>
    %228 = arith.mulf %223, %227 : vector<2x16xf32>
    %cst_75 = arith.constant dense<0.000000e+00> : vector<2x136xf32>
    %229 = tpu.matmul %228, %3, %cst_75 {dimension_numbers = #tpu.dot_dimension_numbers<[1], [0], [0], [1], [0, 0, 1, 1], [], []>} : vector<2x16xf32>, vector<16x136xf32>, vector<2x136xf32> -> vector<2x136xf32>
    %230 = vector.extract_strided_slice %229 {offsets = [0, 128], sizes = [2, 8], strides = [1, 1]} : vector<2x136xf32> to vector<2x8xf32>
    %231 = arith.addf %230, %15 : vector<2x8xf32>
    %232 = vector.extract_strided_slice %229 {offsets = [0, 64], sizes = [2, 64], strides = [1, 1]} : vector<2x136xf32> to vector<2x64xf32>
    %233 = arith.addf %232, %12 : vector<2x64xf32>
    %c0_76 = arith.constant 0 : index
    %234 = memref.load %arg0[%c0_76] : memref<4xi32, #tpu.memory_space<smem>>
    %c1_i32 = arith.constant 1 : i32
    %235 = arith.cmpi eq, %234, %c1_i32 : i32
    %236 = arith.select %235, %51, %233 : vector<2x64xf32>
    %237 = vector.extract_strided_slice %229 {offsets = [0, 0], sizes = [2, 64], strides = [1, 1]} : vector<2x136xf32> to vector<2x64xf32>
    %238 = arith.addf %236, %237 : vector<2x64xf32>
    %239 = vector.extract_strided_slice %238 {offsets = [0, 0], sizes = [2, 48], strides = [1, 1]} : vector<2x64xf32> to vector<2x48xf32>
    %240 = arith.negf %239 : vector<2x48xf32>
    %241 = math.exp %240 : vector<2x48xf32>
    %cst_77 = arith.constant 1.000000e+00 : f32
    %242 = vector.broadcast %cst_77 : f32 to vector<2x48xf32>
    %243 = arith.addf %242, %241 : vector<2x48xf32>
    %244 = arith.divf %242, %243 : vector<2x48xf32>
    %245 = vector.extract_strided_slice %238 {offsets = [0, 48], sizes = [2, 16], strides = [1, 1]} : vector<2x64xf32> to vector<2x16xf32>
    %246 = math.tanh %245 : vector<2x16xf32>
    %247 = vector.extract_strided_slice %244 {offsets = [0, 0], sizes = [2, 16], strides = [1, 1]} : vector<2x48xf32> to vector<2x16xf32>
    %248 = vector.extract_strided_slice %244 {offsets = [0, 16], sizes = [2, 16], strides = [1, 1]} : vector<2x48xf32> to vector<2x16xf32>
    %249 = vector.extract_strided_slice %244 {offsets = [0, 32], sizes = [2, 16], strides = [1, 1]} : vector<2x48xf32> to vector<2x16xf32>
    %250 = arith.mulf %248, %226 : vector<2x16xf32>
    %251 = arith.mulf %247, %246 : vector<2x16xf32>
    %252 = arith.addf %250, %251 : vector<2x16xf32>
    %253 = math.tanh %252 : vector<2x16xf32>
    %254 = arith.mulf %249, %253 : vector<2x16xf32>
    %cst_78 = arith.constant dense<0.000000e+00> : vector<2x136xf32>
    %255 = tpu.matmul %254, %3, %cst_78 {dimension_numbers = #tpu.dot_dimension_numbers<[1], [0], [0], [1], [0, 0, 1, 1], [], []>} : vector<2x16xf32>, vector<16x136xf32>, vector<2x136xf32> -> vector<2x136xf32>
    %256 = vector.extract_strided_slice %255 {offsets = [0, 128], sizes = [2, 8], strides = [1, 1]} : vector<2x136xf32> to vector<2x8xf32>
    %257 = arith.addf %256, %15 : vector<2x8xf32>
    %258 = vector.extract_strided_slice %255 {offsets = [0, 64], sizes = [2, 64], strides = [1, 1]} : vector<2x136xf32> to vector<2x64xf32>
    %259 = arith.addf %258, %12 : vector<2x64xf32>
    %c1_79 = arith.constant 1 : index
    %260 = memref.load %arg0[%c1_79] : memref<4xi32, #tpu.memory_space<smem>>
    %c1_i32_80 = arith.constant 1 : i32
    %261 = arith.cmpi eq, %260, %c1_i32_80 : i32
    %262 = arith.select %261, %55, %259 : vector<2x64xf32>
    %263 = vector.extract_strided_slice %255 {offsets = [0, 0], sizes = [2, 64], strides = [1, 1]} : vector<2x136xf32> to vector<2x64xf32>
    %264 = arith.addf %262, %263 : vector<2x64xf32>
    %265 = vector.extract_strided_slice %264 {offsets = [0, 0], sizes = [2, 48], strides = [1, 1]} : vector<2x64xf32> to vector<2x48xf32>
    %266 = arith.negf %265 : vector<2x48xf32>
    %267 = math.exp %266 : vector<2x48xf32>
    %cst_81 = arith.constant 1.000000e+00 : f32
    %268 = vector.broadcast %cst_81 : f32 to vector<2x48xf32>
    %269 = arith.addf %268, %267 : vector<2x48xf32>
    %270 = arith.divf %268, %269 : vector<2x48xf32>
    %271 = vector.extract_strided_slice %264 {offsets = [0, 48], sizes = [2, 16], strides = [1, 1]} : vector<2x64xf32> to vector<2x16xf32>
    %272 = math.tanh %271 : vector<2x16xf32>
    %273 = vector.extract_strided_slice %270 {offsets = [0, 0], sizes = [2, 16], strides = [1, 1]} : vector<2x48xf32> to vector<2x16xf32>
    %274 = vector.extract_strided_slice %270 {offsets = [0, 16], sizes = [2, 16], strides = [1, 1]} : vector<2x48xf32> to vector<2x16xf32>
    %275 = vector.extract_strided_slice %270 {offsets = [0, 32], sizes = [2, 16], strides = [1, 1]} : vector<2x48xf32> to vector<2x16xf32>
    %276 = arith.mulf %274, %252 : vector<2x16xf32>
    %277 = arith.mulf %273, %272 : vector<2x16xf32>
    %278 = arith.addf %276, %277 : vector<2x16xf32>
    %279 = math.tanh %278 : vector<2x16xf32>
    %280 = arith.mulf %275, %279 : vector<2x16xf32>
    %cst_82 = arith.constant dense<0.000000e+00> : vector<2x136xf32>
    %281 = tpu.matmul %280, %3, %cst_82 {dimension_numbers = #tpu.dot_dimension_numbers<[1], [0], [0], [1], [0, 0, 1, 1], [], []>} : vector<2x16xf32>, vector<16x136xf32>, vector<2x136xf32> -> vector<2x136xf32>
    %282 = vector.extract_strided_slice %281 {offsets = [0, 128], sizes = [2, 8], strides = [1, 1]} : vector<2x136xf32> to vector<2x8xf32>
    %283 = arith.addf %282, %15 : vector<2x8xf32>
    %284 = vector.extract_strided_slice %281 {offsets = [0, 64], sizes = [2, 64], strides = [1, 1]} : vector<2x136xf32> to vector<2x64xf32>
    %285 = arith.addf %284, %12 : vector<2x64xf32>
    %c2_83 = arith.constant 2 : index
    %286 = memref.load %arg0[%c2_83] : memref<4xi32, #tpu.memory_space<smem>>
    %c1_i32_84 = arith.constant 1 : i32
    %287 = arith.cmpi eq, %286, %c1_i32_84 : i32
    %288 = arith.select %287, %59, %285 : vector<2x64xf32>
    %289 = vector.extract_strided_slice %281 {offsets = [0, 0], sizes = [2, 64], strides = [1, 1]} : vector<2x136xf32> to vector<2x64xf32>
    %290 = arith.addf %288, %289 : vector<2x64xf32>
    %291 = vector.extract_strided_slice %290 {offsets = [0, 0], sizes = [2, 48], strides = [1, 1]} : vector<2x64xf32> to vector<2x48xf32>
    %292 = arith.negf %291 : vector<2x48xf32>
    %293 = math.exp %292 : vector<2x48xf32>
    %cst_85 = arith.constant 1.000000e+00 : f32
    %294 = vector.broadcast %cst_85 : f32 to vector<2x48xf32>
    %295 = arith.addf %294, %293 : vector<2x48xf32>
    %296 = arith.divf %294, %295 : vector<2x48xf32>
    %297 = vector.extract_strided_slice %290 {offsets = [0, 48], sizes = [2, 16], strides = [1, 1]} : vector<2x64xf32> to vector<2x16xf32>
    %298 = math.tanh %297 : vector<2x16xf32>
    %299 = vector.extract_strided_slice %296 {offsets = [0, 0], sizes = [2, 16], strides = [1, 1]} : vector<2x48xf32> to vector<2x16xf32>
    %300 = vector.extract_strided_slice %296 {offsets = [0, 16], sizes = [2, 16], strides = [1, 1]} : vector<2x48xf32> to vector<2x16xf32>
    %301 = vector.extract_strided_slice %296 {offsets = [0, 32], sizes = [2, 16], strides = [1, 1]} : vector<2x48xf32> to vector<2x16xf32>
    %302 = arith.mulf %300, %278 : vector<2x16xf32>
    %303 = arith.mulf %299, %298 : vector<2x16xf32>
    %304 = arith.addf %302, %303 : vector<2x16xf32>
    %305 = math.tanh %304 : vector<2x16xf32>
    %306 = arith.mulf %301, %305 : vector<2x16xf32>
    %cst_86 = arith.constant dense<0.000000e+00> : vector<2x136xf32>
    %307 = tpu.matmul %306, %3, %cst_86 {dimension_numbers = #tpu.dot_dimension_numbers<[1], [0], [0], [1], [0, 0, 1, 1], [], []>} : vector<2x16xf32>, vector<16x136xf32>, vector<2x136xf32> -> vector<2x136xf32>
    %308 = vector.extract_strided_slice %307 {offsets = [0, 128], sizes = [2, 8], strides = [1, 1]} : vector<2x136xf32> to vector<2x8xf32>
    %309 = arith.addf %308, %15 : vector<2x8xf32>
    %310 = vector.shape_cast %231 : vector<2x8xf32> to vector<1x2x8xf32>
    %311 = vector.shape_cast %257 : vector<2x8xf32> to vector<1x2x8xf32>
    %312 = vector.shape_cast %283 : vector<2x8xf32> to vector<1x2x8xf32>
    %313 = vector.shape_cast %309 : vector<2x8xf32> to vector<1x2x8xf32>
    %314 = tpu.concatenate %310, %311, %312, %313 in 0 : vector<1x2x8xf32>, vector<1x2x8xf32>, vector<1x2x8xf32>, vector<1x2x8xf32> -> vector<4x2x8xf32>
    %c0_87 = arith.constant 0 : index
    %c0_88 = arith.constant 0 : index
    %c0_89 = arith.constant 0 : index
    %315 = vector.load %arg11[%c0_87, %c0_88, %c0_89] : memref<4x2x8xf32, #tpu.memory_space<vmem>>, vector<4x2x8xf32>
    tpu.vector_store %arg11[%c0_87, %c0_88, %c0_89], %314 {strides = array<i32>} : memref<4x2x8xf32, #tpu.memory_space<vmem>>, vector<4x2x8xf32>,
    return
  }
}

</mosaic_0001>

<bundles_post_ra>
// kernel: seq2seq_forward.1
= control target key start
LH: loop header
LB: loop body
LE: loop exit
PB: predicated region body
PF: predicated region fallthrough
CT: control target
= control target key end

     0   :  { %16 = vsyncpa [#allocation3], 0  ;;  %s3078_s0 = inlined_call_operand.vmem [shape: s32[4], index: 0, kind: input, shape index: {}]   ;;  %s3079_s1 = inlined_call_operand.vmem [shape: f32[8,2,8], index: 1, kind: input, shape index: {}]   ;;  %s3080_s2 = inlined_call_operand.vmem [shape: f32[4,2,8], index: 2, kind: input, shape index: {}]   ;;  %s3081_s3 = inlined_call_operand.vmem [shape: f32[8,64], index: 3, kind: input, shape index: {}]   ;;  %s3082_s4 = inlined_call_operand.vmem [shape: f32[16,64], index: 4, kind: input, shape index: {}]   ;;  %s3083_s5 = inlined_call_operand.vmem [shape: f32[1,64], index: 5, kind: input, shape index: {}]   ;;  %s3084_s6 = inlined_call_operand.vmem [shape: f32[8,64], index: 6, kind: input, shape index: {}]   ;;  %s3085_s7 = inlined_call_operand.vmem [shape: f32[1,64], index: 7, kind: input, shape index: {}]   ;;  %s3086_s8 = inlined_call_operand.vmem [shape: f32[16,136], index: 8, kind: input, shape index: {}]   ;;  %s3087_s9 = inlined_call_operand.vmem [shape: f32[1,64], index: 9, kind: input, shape index: {}]   ;;  %s3088_s10 = inlined_call_operand.vmem [shape: f32[1,8], index: 10, kind: input, shape index: {}]   ;;  %s3089_s11 = inlined_call_operand.vmem [shape: f32[4,2,8], index: 11, kind: output, shape index: {}]  }
   0x1   :  { %s23_s19 = sshll.u32 %s3078_s0, 4  ;;  %s24_s19 = int_to_ptr.vmem [resolvable:$true] %s23_s19 }
   0x2   :  { %s2697_s20 = scalar_lea.vmem %s24_s19, 16  ;;  %p2702_p1 = scmp.lt.s32.totalorder %s24_s19, %s24_s19 }
   0x3   :  { %p2698_p0 = scmp.ne.s32.totalorder %s24_s19, %s2697_s20  ;;  %p2703_p2 = scmp.lt.s32.totalorder %s2697_s20, %s2697_s20 }
   0x5   :  { %p2704_p3 = por %p2703_p2, %p2702_p1 }
   0x7   :  { %p2705_p4 = pnand %p2704_p3, %p2698_p0 }
   0x9   :  { %2708 = shalt.err (!%p2705_p4)
}
   0xa   :  { %s2711_s21 = smov [#allocation2]  }
   0xb   :  { %26 = dma.vmem_to_smem %s24_s19, 16, %s2711_s21, [#allocation3]  }
   0xc   :  { %2709 = dma.done.wait [#allocation3], 16  }
   0xd   :  { %2710 = vsyncadd [#allocation3], 4294967280 }
   0xe   :  { %50 = sfence }
   0xf   :  { %v2785_v0 = vld [vmem:[%s3081_s3] sm:$0xff]  ;;  %vm87_vm0 = vcmask 64512   ;;  %v2712_v2 = vmov 0.0   ;;  %vm2713_vm1 = vmmov 0   ;;  %v2318_v4 = vld [vmem:[%s3079_s1 + $0x8] sm:$0x3] }
  0x10   :  { %v86_v1 = vld [vmem:[%s3079_s1] sm:$0x3]  ;;  %2406 = vmatprep.subr.mxu0 %v2712_v2  ;;  %2408 = vmatprep.mubr.msk.f32.mxu0 %vm2713_vm1, %v2712_v2  ;;  %v2314_v3 = vld [vmem:[%s3079_s1 + $0x4] sm:$0x3]  ;;  %v2322_v5 = vld [vmem:[%s3079_s1 + $0xc] sm:$0x3] }
  0x11   :  { %2407 = vmatpush3.msra.mxu0 %v2785_v0  ;;  %2411 = vmatprep.subr.mxu1 %v2712_v2  ;;  %v2827_v6 = vld [vmem:[%s3084_s6] sm:$0xff]  ;;  %v53_v9 = vld [vmem:[%s3082_s4 + $0x8] sm:$0xff]  ;;  %v2714_v12 = vmov 0.0|0.0   ;;  %s2715_s21 = smov 80   ;;  %s2716_s22 = smov 16   ;;  %vm980_vm2 = vcmask 130048  }
  0x12   :  { %2409 = vmatmul.mubr.msk.f32.vlgmr.msra.gmra.mrb[0].mxu0 %vm87_vm0, %v86_v1  ;;  %2416 = vmatprep.subr.mxu0 %v2712_v2  ;;  %v686_v7 = vld [vmem:[%s3080_s2] sm:$0x3]  ;;  %v2329_v10 = vld [vmem:[%s3080_s2 + $0x4] sm:$0x3]  ;;  %v2312_v31 = vld [vmem:[%s3079_s1 + $0x2] sm:$0x3] }
  0x13   :  { %2417 = vmatpush3.msra.mxu0 %v2785_v0  ;;  %2418 = vmatprep.mubr.msk.f32.mxu0 %vm2713_vm1, %v2712_v2  ;;  %v52_v8 = vld [vmem:[%s3082_s4] sm:$0xff]  ;;  %v2320_v33 = vld [vmem:[%s3079_s1 + $0xa] sm:$0x3]  ;;  %v2324_v35 = vld [vmem:[%s3079_s1 + $0xe] sm:$0x3]  ;;  %s2718_s19 = smov 64  }
  0x14   :  { %2426 = vmatprep.subr.mxu0 %v2712_v2  ;;  %2412 = vmatpush3.msra.mxu1 %v2785_v0  ;;  %v2850_v11 = vpack.c.bf16 %v53_v9, %v52_v8  ;;  %v2870_v17 = vld [vmem:[%s3083_s5] ss:$0 sm:$0xff]  ;;  %v2316_v32 = vld [vmem:[%s3079_s1 + $0x6] sm:$0x3]  ;;  %v2327_v36 = vld [vmem:[%s3080_s2 + $0x2] sm:$0x3] }
  0x15   :  { %2413 = vmatprep.mubr.msk.f32.mxu1 %vm2713_vm1, %v2712_v2  ;;  %2421 = vmatprep.subr.mxu1 %v2712_v2  ;;  %s2717_s1 = smov 96   ;;  %vm2297_vm3 = vcmask 58368   ;;  %s1960_s23 = sld [smem:[#allocation2]] }
  0x16   :  { %2419 = vmatmul.mubr.msk.f32.vlgmr.msra.gmra.mrb[2].mxu0 %vm87_vm0, %v2314_v3  ;;  %2414 = vmatmul.mubr.msk.f32.vlgmr.msra.gmra.mrb[0].mxu1 %vm87_vm0, %v2312_v31  ;;  %s2352_s3 = sld [smem:[#allocation2 + $0x1]]  ;;  %s2355_s28 = sld [smem:[#allocation2 + $0x2]] }
  0x17   :  { %2427 = vmatpush3.msra.mxu0 %v2785_v0  ;;  %2428 = vmatprep.mubr.msk.f32.mxu0 %vm2713_vm1, %v2712_v2 }
  0x18   :  { %2436 = vmatprep.subr.mxu0 %v2712_v2  ;;  %2422 = vmatpush3.msra.mxu1 %v2785_v0 }
  0x19   :  { %2423 = vmatprep.mubr.msk.f32.mxu1 %vm2713_vm1, %v2712_v2  ;;  %2431 = vmatprep.subr.mxu1 %v2712_v2 }
  0x1a   :  { %2429 = vmatmul.mubr.msk.f32.vlgmr.msra.gmra.mrb[4].mxu0 %vm87_vm0, %v2318_v4  ;;  %2424 = vmatmul.mubr.msk.f32.vlgmr.msra.gmra.mrb[2].mxu1 %vm87_vm0, %v2316_v32 }
  0x1b   :  { %2437 = vmatpush3.msra.mxu0 %v2785_v0  ;;  %2438 = vmatprep.mubr.msk.f32.mxu0 %vm2713_vm1, %v2712_v2  ;;  %p1961_p5 = scmp.eq.s32.totalorder %s1960_s23, 1 }
  0x1c   :  { %2446 = vmatprep.subr.mxu0 %v2712_v2  ;;  %2432 = vmatpush3.msra.mxu1 %v2785_v0  ;;  %p2074_p6 = scmp.eq.s32.totalorder %s2352_s3, 1  ;;  %p2187_p7 = scmp.eq.s32.totalorder %s2355_s28, 1 }
  0x1d   :  { %2433 = vmatprep.mubr.msk.f32.mxu1 %vm2713_vm1, %v2712_v2  ;;  %2441 = vmatprep.subr.mxu1 %v2712_v2  ;;  %s1962_s24 = scalar_select %p1961_p5, 1, 0 }
  0x1e   :  { %2439 = vmatmul.mubr.msk.f32.vlgmr.msra.gmra.mrb[6].mxu0 %vm87_vm0, %v2322_v5  ;;  %2434 = vmatmul.mubr.msk.f32.vlgmr.msra.gmra.mrb[4].mxu1 %vm87_vm0, %v2320_v33  ;;  %s2075_s25 = scalar_select %p2074_p6, 1, 0 }
  0x1f   :  { %2447 = vmatpush3.msra.mxu0 %v2827_v6  ;;  %2448 = vmatprep.mubr.msk.f32.mxu0 %vm2713_vm1, %v2712_v2  ;;  %s2188_s29 = scalar_select %p2187_p7, 1, 0 }
  0x20   :  { %2456 = vmatprep.subr.mxu0 %v2712_v2  ;;  %2442 = vmatpush3.msra.mxu1 %v2785_v0 }
  0x21   :  { %2443 = vmatprep.mubr.msk.f32.mxu1 %vm2713_vm1, %v2712_v2  ;;  %2451 = vmatprep.subr.mxu1 %v2712_v2 }
  0x22   :  { %2449 = vmatmul.mubr.msk.f32.vlgmr.msra.gmra.mrb[8].mxu0 %vm87_vm0, %v686_v7  ;;  %2444 = vmatmul.mubr.msk.f32.vlgmr.msra.gmra.mrb[6].mxu1 %vm87_vm0, %v2324_v35 }
  0x23   :  { %2457 = vmatpush3.msra.mxu0 %v2827_v6  ;;  %2458 = vmatprep.mubr.msk.f32.mxu0 %vm2713_vm1, %v2712_v2 }
  0x24   :  { %2522 = vmatprep.subr.bf16.mxu0 %v2714_v12  ;;  %2452 = vmatpush3.msra.mxu1 %v2827_v6 }
  0x25   :  { %2453 = vmatprep.mubr.msk.f32.mxu1 %vm2713_vm1, %v2712_v2  ;;  %2461 = vmatprep.subr.mxu1 %v2712_v2 }
  0x26   :  { %2459 = vmatmul.mubr.msk.f32.vlgmr.msra.gmra.mrb[10].mxu0 %vm87_vm0, %v2329_v10  ;;  %2454 = vmatmul.mubr.msk.f32.vlgmr.msra.gmra.mrb[8].mxu1 %vm87_vm0, %v2327_v36 }
  0x27   :  { %2524 = vmatpush3.bf16.msra.mxu0 %v2850_v11  ;;  %2470 = vmatprep.mubr.msk.f32.mxu0 %vm2713_vm1, %v2712_v2 }
  0x28   :  { %2528 = vmatprep.subr.bf16.mxu0 %v2714_v12  ;;  %2462 = vmatpush3.msra.mxu1 %v2827_v6 }
  0x29   :  { %2463 = vmatprep.mubr.msk.f32.mxu1 %vm2713_vm1, %v2712_v2  ;;  %2525 = vmatprep.subr.bf16.mxu1 %v2714_v12 }
  0x2a   :  { %2471 = vmatmul.mubr.f32.vlgmr.msra.gmra.mrb[0].mxu0 %v2712_v2  ;;  %2464 = vmatmul.mubr.msk.f32.vlgmr.msra.gmra.mrb[10].mxu1 %vm87_vm0, %v2324_v35 }
  0x2b   :  { %2530 = vmatpush3.bf16.msra.mxu0 %v2850_v11  ;;  %2484 = vmatprep.mubr.msk.f32.mxu0 %vm2713_vm1, %v2712_v2 }
  0x2c   :  { %2534 = vmatprep.subr.bf16.mxu0 %v2714_v12  ;;  %2527 = vmatpush3.bf16.msra.mxu1 %v2850_v11 }
  0x2d   :  { %2477 = vmatprep.mubr.msk.f32.mxu1 %vm2713_vm1, %v2712_v2  ;;  %2531 = vmatprep.subr.bf16.mxu1 %v2714_v12 }
  0xf5   :  { %v2863_v13 = vpop.f32.mrb[8].mxu0 }
  0xf6   :  { %v2450_v14 = vpop.f32.mrb[9].mxu0 }
  0xf9   :  { %v2865_v15 = vpop.f32.mrb[10].mxu0  ;;  %v2922_v39 = vpop.f32.mrb[8].mxu1 }
  0xfa   :  { %v2460_v16 = vpop.f32.mrb[11].mxu0  ;;  %v2455_v40 = vpop.f32.mrb[9].mxu1 }
  0xfd   :  { %v1050_v18 = vpop.f32.mrb[0].mxu0 }
  0xfe   :  { %v2566_v19 = vadd.f32 %v2870_v17, %v1050_v18  ;;  %v2472_v20 = vpop.f32.mrb[1].mxu0 }
 0x100   :  { %2601 = vtanh.f32 %v2566_v19  ;;  %v2332_v22 = vmul.f32 -1.442695, %v2566_v19 }
 0x102   :  { %2603 = vpow2.f32 %v2332_v22 }
 0x10a   :  { %v2602_v21 = vpop.eup %2601 }
 0x10b   :  { %1064 = vrot.lane.b32.xlu0 %v2602_v21, %s2715_s21 }
 0x10c   :  { %v2604_v23 = vpop.eup %2603 }
 0x10d   :  { %v1058_v24 = vadd.f32 1.0, %v2604_v23 }
 0x10f   :  { %2605 = vrcp.f32 %v1058_v24 }
 0x119   :  { %v2606_v25 = vpop.eup %2605 }
 0x11a   :  { %v1062_v28 = vmul.f32 0.0, %v2606_v25 }
 0x17d   :  { %v1065_v26 = vpop.permute.xlu0 %1064 }
 0x17e   :  { %v1067_v27 = vmul.f32 %v2606_v25, %v1065_v26 }
 0x180   :  { %1069 = vrot.lane.b32.xlu0 %v1067_v27, %s2716_s22 }
 0x1f2   :  { %v1070_v29 = vpop.permute.xlu0 %1069 }
 0x1f3   :  { %v1072_v30 = vadd.f32 %v1070_v29, %v1062_v28 }
 0x1f5   :  { %2607 = vtanh.f32 %v1072_v30 }
 0x1ff   :  { %v2608_v34 = vpop.eup %2607 }
 0x200   :  { %1075 = vrot.lane.b32.xlu1 %v2608_v34, %s2716_s22 }
 0x272   :  { %v1076_v37 = vpop.permute.xlu1 %1075 }
 0x273   :  { %v1078_v38 = vmul.f32 %v2606_v25, %v1076_v37 }
 0x275   :  { %1080 = vrot.lane.b32.xlu1 %v1078_v38, %s2717_s1 }
 0x2e7   :  { %v1081_v41 = vpop.permute.xlu1 %1080 }
 0x2e8   :  { %2478 = vmatmul.mubr.msk.f32.vlgmr.msra.gmra.mrb[0].mxu1 %vm980_vm2, %v1081_v41 }
 0x2e9   :  { %2533 = vmatpush3.bf16.msra.mxu1 %v2850_v11  ;;  %2491 = vmatprep.mubr.msk.f32.mxu1 %vm2713_vm1, %v2712_v2 }
 0x2ea   :  { %2537 = vmatprep.subr.bf16.mxu1 %v2714_v12 }
 0x3bb   :  { %v1150_v42 = vpop.f32.mrb[0].mxu1 }
 0x3bc   :  { %v2567_v43 = vadd.f32 %v2870_v17, %v1150_v42  ;;  %v2479_v44 = vpop.f32.mrb[1].mxu1 }
 0x3be   :  { %2609 = vtanh.f32 %v2567_v43  ;;  %v2334_v46 = vmul.f32 -1.442695, %v2567_v43 }
 0x3c0   :  { %2611 = vpow2.f32 %v2334_v46 }
 0x3c8   :  { %v2610_v45 = vpop.eup %2609 }
 0x3c9   :  { %1164 = vrot.lane.b32.xlu0 %v2610_v45, %s2715_s21 }
 0x3ca   :  { %v2612_v47 = vpop.eup %2611 }
 0x3cb   :  { %v1158_v48 = vadd.f32 1.0, %v2612_v47 }
 0x3cd   :  { %2613 = vrcp.f32 %v1158_v48 }
 0x3d7   :  { %v2614_v49 = vpop.eup %2613 }
 0x3d8   :  { %v1162_v52 = vmul.f32 %v2614_v49, %v1072_v30 }
 0x43b   :  { %v1165_v50 = vpop.permute.xlu0 %1164 }
 0x43c   :  { %v1167_v51 = vmul.f32 %v2614_v49, %v1165_v50 }
 0x43e   :  { %1169 = vrot.lane.b32.xlu1 %v1167_v51, %s2716_s22 }
 0x4b0   :  { %v1170_v53 = vpop.permute.xlu1 %1169 }
 0x4b1   :  { %v1172_v54 = vadd.f32 %v1170_v53, %v1162_v52 }
 0x4b3   :  { %2615 = vtanh.f32 %v1172_v54 }
 0x4bd   :  { %v2616_v55 = vpop.eup %2615 }
 0x4be   :  { %1175 = vrot.lane.b32.xlu0 %v2616_v55, %s2716_s22 }
 0x530   :  { %v1176_v56 = vpop.permute.xlu0 %1175 }
 0x531   :  { %v1178_v57 = vmul.f32 %v2614_v49, %v1176_v56 }
 0x533   :  { %1180 = vrot.lane.b32.xlu1 %v1178_v57, %s2717_s1 }
 0x5a5   :  { %v1181_v58 = vpop.permute.xlu1 %1180 }
 0x5a6   :  { %2485 = vmatmul.mubr.msk.f32.vlgmr.msra.gmra.mrb[2].mxu0 %vm980_vm2, %v1181_v58 }
 0x5a7   :  { %2536 = vmatpush3.bf16.msra.mxu0 %v2850_v11  ;;  %2498 = vmatprep.mubr.msk.f32.mxu0 %vm2713_vm1, %v2712_v2 }
 0x5a8   :  { %2540 = vmatprep.subr.bf16.mxu0 %v2714_v12 }
 0x679   :  { %v1250_v59 = vpop.f32.mrb[2].mxu0 }
 0x67a   :  { %v2568_v60 = vadd.f32 %v2870_v17, %v1250_v59  ;;  %v2486_v61 = vpop.f32.mrb[3].mxu0 }
 0x67c   :  { %2617 = vtanh.f32 %v2568_v60  ;;  %v2336_v63 = vmul.f32 -1.442695, %v2568_v60 }
 0x67e   :  { %2619 = vpow2.f32 %v2336_v63 }
 0x686   :  { %v2618_v62 = vpop.eup %2617 }
 0x687   :  { %1264 = vrot.lane.b32.xlu0 %v2618_v62, %s2715_s21 }
 0x688   :  { %v2620_v0 = vpop.eup %2619 }
 0x689   :  { %v1258_v1 = vadd.f32 1.0, %v2620_v0 }
 0x68b   :  { %2621 = vrcp.f32 %v1258_v1 }
 0x695   :  { %v2622_v3 = vpop.eup %2621 }
 0x696   :  { %v1262_v6 = vmul.f32 %v2622_v3, %v1172_v54 }
 0x6f9   :  { %v1265_v4 = vpop.permute.xlu0 %1264 }
 0x6fa   :  { %v1267_v5 = vmul.f32 %v2622_v3, %v1265_v4 }
 0x6fc   :  { %1269 = vrot.lane.b32.xlu1 %v1267_v5, %s2716_s22 }
 0x76e   :  { %v1270_v7 = vpop.permute.xlu1 %1269 }
 0x76f   :  { %v1272_v8 = vadd.f32 %v1270_v7, %v1262_v6 }
 0x771   :  { %2623 = vtanh.f32 %v1272_v8 }
 0x77b   :  { %v2624_v9 = vpop.eup %2623 }
 0x77c   :  { %1275 = vrot.lane.b32.xlu0 %v2624_v9, %s2716_s22 }
 0x7ee   :  { %v1276_v10 = vpop.permute.xlu0 %1275 }
 0x7ef   :  { %v1278_v14 = vmul.f32 %v2622_v3, %v1276_v10 }
 0x7f1   :  { %1280 = vrot.lane.b32.xlu1 %v1278_v14, %s2717_s1 }
 0x863   :  { %v1281_v16 = vpop.permute.xlu1 %1280 }
 0x864   :  { %2492 = vmatmul.mubr.msk.f32.vlgmr.msra.gmra.mrb[2].mxu1 %vm980_vm2, %v1281_v16 }
 0x865   :  { %2539 = vmatpush3.bf16.msra.mxu1 %v2850_v11  ;;  %2505 = vmatprep.mubr.msk.f32.mxu1 %vm2713_vm1, %v2712_v2 }
 0x866   :  { %2543 = vmatprep.subr.bf16.mxu1 %v2714_v12 }
 0x937   :  { %v1350_v18 = vpop.f32.mrb[2].mxu1 }
 0x938   :  { %v2569_v19 = vadd.f32 %v2870_v17, %v1350_v18  ;;  %v2493_v20 = vpop.f32.mrb[3].mxu1 }
 0x93a   :  { %2625 = vtanh.f32 %v2569_v19  ;;  %v2338_v22 = vmul.f32 -1.442695, %v2569_v19 }
 0x93c   :  { %2627 = vpow2.f32 %v2338_v22 }
 0x944   :  { %v2626_v21 = vpop.eup %2625 }
 0x945   :  { %1364 = vrot.lane.b32.xlu0 %v2626_v21, %s2715_s21 }
 0x946   :  { %v2628_v23 = vpop.eup %2627 }
 0x947   :  { %v1358_v24 = vadd.f32 1.0, %v2628_v23 }
 0x949   :  { %2629 = vrcp.f32 %v1358_v24 }
 0x953   :  { %v2630_v25 = vpop.eup %2629 }
 0x954   :  { %v1362_v28 = vmul.f32 %v2630_v25, %v1272_v8 }
 0x9b7   :  { %v1365_v26 = vpop.permute.xlu0 %1364 }
 0x9b8   :  { %v1367_v27 = vmul.f32 %v2630_v25, %v1365_v26 }
 0x9ba   :  { %1369 = vrot.lane.b32.xlu1 %v1367_v27, %s2716_s22 }
 0xa2c   :  { %v1370_v12 = vpop.permute.xlu1 %1369 }
 0xa2d   :  { %v1372_v29 = vadd.f32 %v1370_v12, %v1362_v28 }
 0xa2f   :  { %2631 = vtanh.f32 %v1372_v29 }
 0xa39   :  { %v2632_v30 = vpop.eup %2631 }
 0xa3a   :  { %1375 = vrot.lane.b32.xlu0 %v2632_v30, %s2716_s22 }
 0xaac   :  { %v1376_v31 = vpop.permute.xlu0 %1375 }
 0xaad   :  { %v1378_v32 = vmul.f32 %v2630_v25, %v1376_v31 }
 0xaaf   :  { %1380 = vrot.lane.b32.xlu1 %v1378_v32, %s2717_s1 }
 0xb21   :  { %v1381_v33 = vpop.permute.xlu1 %1380 }
 0xb22   :  { %2499 = vmatmul.mubr.msk.f32.vlgmr.msra.gmra.mrb[4].mxu0 %vm980_vm2, %v1381_v33 }
 0xb23   :  { %2542 = vmatpush3.bf16.msra.mxu0 %v2850_v11  ;;  %2512 = vmatprep.mubr.msk.f32.mxu0 %vm2713_vm1, %v2712_v2 }
 0xbf5   :  { %v1450_v34 = vpop.f32.mrb[4].mxu0 }
 0xbf6   :  { %v2570_v35 = vadd.f32 %v2870_v17, %v1450_v34  ;;  %v2500_v36 = vpop.f32.mrb[5].mxu0 }
 0xbf8   :  { %2633 = vtanh.f32 %v2570_v35  ;;  %v2340_v38 = vmul.f32 -1.442695, %v2570_v35 }
 0xbfa   :  { %2635 = vpow2.f32 %v2340_v38 }
 0xc02   :  { %v2634_v37 = vpop.eup %2633 }
 0xc03   :  { %1464 = vrot.lane.b32.xlu0 %v2634_v37, %s2715_s21 }
 0xc04   :  { %v2636_v40 = vpop.eup %2635 }
 0xc05   :  { %v1458_v41 = vadd.f32 1.0, %v2636_v40  ;;  %v58_v40 = vld [vmem:[%s3086_s8 + $0x18] sm:$0xff] }
 0xc07   :  { %2637 = vrcp.f32 %v1458_v41  ;;  %v55_v41 = vld [vmem:[%s3086_s8] sm:$0xff] }
 0xc11   :  { %v2638_v42 = vpop.eup %2637 }
 0xc12   :  { %v1462_v45 = vmul.f32 %v2638_v42, %v1372_v29 }
 0xc75   :  { %v1465_v43 = vpop.permute.xlu0 %1464 }
 0xc76   :  { %v1467_v44 = vmul.f32 %v2638_v42, %v1465_v43  ;;  %v57_v43 = vld [vmem:[%s3086_s8 + $0x10] sm:$0xff] }
 0xc78   :  { %1469 = vrot.lane.b32.xlu1 %v1467_v44, %s2716_s22  ;;  %v2996_v44 = vpack.c.bf16 %v57_v43, %v55_v41 }
 0xcea   :  { %v1470_v46 = vpop.permute.xlu1 %1469 }
 0xceb   :  { %v1472_v47 = vadd.f32 %v1470_v46, %v1462_v45 }
 0xced   :  { %2639 = vtanh.f32 %v1472_v47 }
 0xcf7   :  { %v2640_v48 = vpop.eup %2639 }
 0xcf8   :  { %1475 = vrot.lane.b32.xlu0 %v2640_v48, %s2716_s22 }
 0xd6a   :  { %v1476_v49 = vpop.permute.xlu0 %1475 }
 0xd6b   :  { %v1478_v50 = vmul.f32 %v2638_v42, %v1476_v49  ;;  %v3008_v49 = vld [vmem:[%s3085_s7] ss:$0 sm:$0xff] }
 0xd6d   :  { %1480 = vrot.lane.b32.xlu1 %v1478_v50, %s2717_s1 }
 0xddf   :  { %v1481_v51 = vpop.permute.xlu1 %1480 }
 0xde0   :  { %2506 = vmatmul.mubr.msk.f32.vlgmr.msra.gmra.mrb[4].mxu1 %vm980_vm2, %v1481_v51 }
 0xde1   :  { %2545 = vmatpush3.bf16.msra.mxu1 %v2850_v11  ;;  %2519 = vmatprep.mubr.msk.f32.mxu1 %vm2713_vm1, %v2712_v2 }
 0xeb3   :  { %v1550_v52 = vpop.f32.mrb[4].mxu1 }
 0xeb4   :  { %v2571_v53 = vadd.f32 %v2870_v17, %v1550_v52  ;;  %v2507_v54 = vpop.f32.mrb[5].mxu1 }
 0xeb6   :  { %2641 = vtanh.f32 %v2571_v53  ;;  %v2342_v56 = vmul.f32 -1.442695, %v2571_v53 }
 0xeb8   :  { %2643 = vpow2.f32 %v2342_v56 }
 0xec0   :  { %v2642_v55 = vpop.eup %2641 }
 0xec1   :  { %1564 = vrot.lane.b32.xlu0 %v2642_v55, %s2715_s21 }
 0xec2   :  { %v2644_v57 = vpop.eup %2643 }
 0xec3   :  { %v1558_v58 = vadd.f32 1.0, %v2644_v57 }
 0xec5   :  { %2645 = vrcp.f32 %v1558_v58 }
 0xecf   :  { %v2646_v59 = vpop.eup %2645 }
 0xed0   :  { %v1562_v11 = vmul.f32 %v2646_v59, %v1472_v47 }
 0xf33   :  { %v1565_v60 = vpop.permute.xlu0 %1564 }
 0xf34   :  { %v1567_v61 = vmul.f32 %v2646_v59, %v1565_v60 }
 0xf36   :  { %1569 = vrot.lane.b32.xlu1 %v1567_v61, %s2716_s22 }
 0xfa8   :  { %v1570_v62 = vpop.permute.xlu1 %1569 }
 0xfa9   :  { %v1572_v63 = vadd.f32 %v1570_v62, %v1562_v11 }
 0xfab   :  { %2647 = vtanh.f32 %v1572_v63 }
 0xfb5   :  { %v2648_v0 = vpop.eup %2647 }
 0xfb6   :  { %1575 = vrot.lane.b32.xlu0 %v2648_v0, %s2716_s22 }
0x1028   :  { %v1576_v1 = vpop.permute.xlu0 %1575 }
0x1029   :  { %v1578_v3 = vmul.f32 %v2646_v59, %v1576_v1 }
0x102b   :  { %1580 = vrot.lane.b32.xlu1 %v1578_v3, %s2717_s1 }
0x109d   :  { %v1581_v4 = vpop.permute.xlu1 %1580 }
0x109e   :  { %2513 = vmatmul.mubr.msk.f32.vlgmr.msra.gmra.mrb[6].mxu0 %vm980_vm2, %v1581_v4 }
0x109f   :  { %1948 = vmatprep.mubr.f32.mxu0 %v2712_v2 }
0x1171   :  { %v1650_v5 = vpop.f32.mrb[6].mxu0 }
0x1172   :  { %v2572_v6 = vadd.f32 %v2870_v17, %v1650_v5  ;;  %v2514_v7 = vpop.f32.mrb[7].mxu0  ;;  %v3027_v5 = vld [vmem:[%s3088_s10] ss:$0 sm:$0xff] }
0x1174   :  { %2649 = vtanh.f32 %v2572_v6  ;;  %v2344_v9 = vmul.f32 -1.442695, %v2572_v6 }
0x1176   :  { %2651 = vpow2.f32 %v2344_v9 }
0x117e   :  { %v2650_v8 = vpop.eup %2649 }
0x117f   :  { %1664 = vrot.lane.b32.xlu0 %v2650_v8, %s2715_s21 }
0x1180   :  { %v2652_v10 = vpop.eup %2651 }
0x1181   :  { %v1658_v14 = vadd.f32 1.0, %v2652_v10  ;;  %v1963_v10 = vstv %s1962_s24 }
0x1182   :  { %vm1964_vm4 = vcmp.eq.s32.totalorder %v1963_v10, 1 }
0x1183   :  { %2653 = vrcp.f32 %v1658_v14  ;;  %v757_v14 = vadd.f32 %v3008_v49, %v2863_v13 }
0x118d   :  { %v2654_v16 = vpop.eup %2653 }
0x118e   :  { %v1662_v20 = vmul.f32 %v2654_v16, %v1572_v63  ;;  %v2309_v63 = vld [vmem:[%s3087_s9] ss:$0 sm:$0xff] }
0x11f1   :  { %v1665_v18 = vpop.permute.xlu0 %1664 }
0x11f2   :  { %v1667_v19 = vmul.f32 %v2654_v16, %v1665_v18 }
0x11f4   :  { %1669 = vrot.lane.b32.xlu1 %v1667_v19, %s2716_s22 }
0x1266   :  { %v1670_v21 = vpop.permute.xlu1 %1669 }
0x1267   :  { %v1672_v22 = vadd.f32 %v1670_v21, %v1662_v20 }
0x1269   :  { %2655 = vtanh.f32 %v1672_v22 }
0x1273   :  { %v2656_v23 = vpop.eup %2655 }
0x1274   :  { %1675 = vrot.lane.b32.xlu0 %v2656_v23, %s2716_s22 }
0x12e6   :  { %v1676_v24 = vpop.permute.xlu0 %1675 }
0x12e7   :  { %v1678_v25 = vmul.f32 %v2654_v16, %v1676_v24 }
0x12e9   :  { %1680 = vrot.lane.b32.xlu1 %v1678_v25, %s2717_s1 }
0x135b   :  { %v1681_v26 = vpop.permute.xlu1 %1680 }
0x135c   :  { %2520 = vmatmul.mubr.msk.f32.vlgmr.msra.gmra.mrb[6].mxu1 %vm980_vm2, %v1681_v26 }
0x135d   :  { %1848 = vmatprep.mubr.f32.mxu1 %v2712_v2 }
0x142f   :  { %v1750_v27 = vpop.f32.mrb[6].mxu1 }
0x1430   :  { %v2573_v28 = vadd.f32 %v2870_v17, %v1750_v27  ;;  %v2521_v12 = vpop.f32.mrb[7].mxu1  ;;  %v56_v17 = vld [vmem:[%s3086_s8 + $0x8] sm:$0xff] }
0x1431   :  { %v2546_v42 = vpack.c.bf16 %v58_v40, %v56_v17 }
0x1432   :  { %2657 = vtanh.f32 %v2573_v28  ;;  %v2346_v30 = vmul.f32 -1.442695, %v2573_v28 }
0x1433   :  { %2547 = vmatprep.subr.bf16.mxu1 %v2546_v42  ;;  %2551 = vmatprep.subr.bf16.mxu0 %v2546_v42 }
0x1434   :  { %2659 = vpow2.f32 %v2346_v30  ;;  %2549 = vmatpush1.bf16.msra.mxu1 %v2996_v44  ;;  %2553 = vmatpush1.bf16.msra.mxu0 %v2996_v44 }
0x1435   :  { %2555 = vmatprep.subr.bf16.mxu0 %v2546_v42  ;;  %2559 = vmatprep.subr.bf16.mxu1 %v2546_v42 }
0x143c   :  { %v2658_v29 = vpop.eup %2657 }
0x143d   :  { %1764 = vrot.lane.b32.xlu0 %v2658_v29, %s2715_s21 }
0x143e   :  { %v2660_v31 = vpop.eup %2659 }
0x143f   :  { %v1758_v32 = vadd.f32 1.0, %v2660_v31 }
0x1441   :  { %2661 = vrcp.f32 %v1758_v32 }
0x144b   :  { %v2662_v33 = vpop.eup %2661 }
0x144c   :  { %v1762_v36 = vmul.f32 %v2662_v33, %v1672_v22 }
0x14af   :  { %v1765_v34 = vpop.permute.xlu0 %1764 }
0x14b0   :  { %v1767_v35 = vmul.f32 %v2662_v33, %v1765_v34 }
0x14b2   :  { %1769 = vrot.lane.b32.xlu1 %v1767_v35, %s2716_s22 }
0x1524   :  { %v1770_v37 = vpop.permute.xlu1 %1769 }
0x1525   :  { %v1772_v38 = vadd.f32 %v1770_v37, %v1762_v36  ;;  %v2076_v36 = vstv %s2075_s25 }
0x1526   :  { %vm2077_vm5 = vcmp.eq.s32.totalorder %v2076_v36, 1 }
0x1527   :  { %2663 = vtanh.f32 %v1772_v38 }
0x1531   :  { %v2664_v45 = vpop.eup %2663 }
0x1532   :  { %1775 = vrot.lane.b32.xlu0 %v2664_v45, %s2716_s22 }
0x15a4   :  { %v1776_v46 = vpop.permute.xlu0 %1775 }
0x15a5   :  { %v1778_v47 = vmul.f32 %v2662_v33, %v1776_v46 }
0x15a7   :  { %1780 = vrot.lane.b32.xlu1 %v1778_v47, %s2717_s1 }
0x1619   :  { %v1781_v48 = vpop.permute.xlu1 %1780 }
0x161a   :  { %2347 = vmatmul.mubr.msk.f32.vlgmr.msra.gmra.mrb[10].mxu1 %vm980_vm2, %v1781_v48 }
0x161b   :  { %2561 = vmatpush1.bf16.msra.mxu1 %v2996_v44  ;;  %2177 = vmatprep.mubr.f32.mxu1 %v2712_v2 }
0x16ed   :  { %v1850_v50 = vpop.f32.mrb[10].mxu1 }
0x16ee   :  { %v2574_v51 = vadd.f32 %v3008_v49, %v1850_v50  ;;  %v1852_v52 = vpop.f32.mrb[11].mxu1 }
0x16f0   :  { %2665 = vtanh.f32 %v2574_v51  ;;  %v2348_v54 = vmul.f32 -1.442695, %v2574_v51 }
0x16f2   :  { %2667 = vpow2.f32 %v2348_v54 }
0x16fa   :  { %v2666_v53 = vpop.eup %2665 }
0x16fb   :  { %1864 = vrot.lane.b32.xlu0 %v2666_v53, %s2715_s21 }
0x16fc   :  { %v2668_v55 = vpop.eup %2667 }
0x16fd   :  { %v1858_v56 = vadd.f32 1.0, %v2668_v55 }
0x16ff   :  { %2669 = vrcp.f32 %v1858_v56 }
0x1709   :  { %v2670_v57 = vpop.eup %2669 }
0x170a   :  { %v1862_v60 = vmul.f32 %v2670_v57, %v1772_v38 }
0x176d   :  { %v1865_v58 = vpop.permute.xlu0 %1864 }
0x176e   :  { %v1867_v59 = vmul.f32 %v2670_v57, %v1865_v58  ;;  %v2189_v58 = vstv %s2188_s29 }
0x176f   :  { %vm2190_vm6 = vcmp.eq.s32.totalorder %v2189_v58, 1 }
0x1770   :  { %1869 = vrot.lane.b32.xlu1 %v1867_v59, %s2716_s22  ;;  %v907_v59 = vadd.f32 %v3008_v49, %v2865_v15 }
0x17e2   :  { %v1870_v61 = vpop.permute.xlu1 %1869 }
0x17e3   :  { %v1872_v11 = vadd.f32 %v1870_v61, %v1862_v60 }
0x17e5   :  { %2671 = vtanh.f32 %v1872_v11 }
0x17ef   :  { %v2672_v62 = vpop.eup %2671 }
0x17f0   :  { %1875 = vrot.lane.b32.xlu0 %v2672_v62, %s2716_s22 }
0x17f4   :  { %1956 = vrot.lane.b32.xlu0 %v2309_v63, %s2718_s19 }
0x1862   :  { %v1876_v0 = vpop.permute.xlu0 %1875 }
0x1863   :  { %v1878_v1 = vmul.f32 %v2670_v57, %v1876_v0 }
0x1865   :  { %1880 = vrot.lane.b32.xlu1 %v1878_v1, %s2717_s1 }
0x1866   :  { %v3022_v4 = vpop.permute.xlu0 %1956 }
0x18d7   :  { %v1881_v3 = vpop.permute.xlu1 %1880 }
0x18d8   :  { %2349 = vmatmul.mubr.msk.f32.vlgmr.msra.gmra.mrb[12].mxu0 %vm980_vm2, %v1881_v3 }
0x18d9   :  { %2557 = vmatpush1.bf16.msra.mxu0 %v2996_v44  ;;  %2064 = vmatprep.mubr.f32.mxu0 %v2712_v2 }
0x18da   :  { %2563 = vmatprep.subr.bf16.mxu0 %v2546_v42 }
0x19ab   :  { %v1950_v6 = vpop.f32.mrb[12].mxu0 }
0x19ac   :  { %v1959_v7 = vadd.f32 %v3022_v4, %v1950_v6  ;;  %v1952_v8 = vpop.f32.mrb[13].mxu0 }
0x19ad   :  { %v1955_v9 = vadd.f32 %v3027_v5, %v1952_v8 }
0x19ae   :  { %1966 = vrot.lane.b32.xlu1 %v1959_v7, %s2718_s19 }
0x19af   :  { %2298 = vst.msk [vmem:[%s3089_s11] sm:$0x3] %vm2297_vm3, %v1955_v9 }
0x1a20   :  { %v1967_v16 = vpop.permute.xlu1 %1966 }
0x1a21   :  { %v1969_v18 = vsel %vm1964_vm4, %v757_v14, %v1967_v16 }
0x1a22   :  { %v1970_v19 = vadd.f32 %v1969_v18, %v1950_v6 }
0x1a24   :  { %2673 = vtanh.f32 %v1970_v19  ;;  %v2350_v21 = vmul.f32 -1.442695, %v1970_v19 }
0x1a26   :  { %2675 = vpow2.f32 %v2350_v21 }
0x1a2e   :  { %v2674_v20 = vpop.eup %2673 }
0x1a2f   :  { %1980 = vrot.lane.b32.xlu0 %v2674_v20, %s2715_s21 }
0x1a30   :  { %v2676_v22 = vpop.eup %2675 }
0x1a31   :  { %v1974_v23 = vadd.f32 1.0, %v2676_v22 }
0x1a33   :  { %2677 = vrcp.f32 %v1974_v23 }
0x1a3d   :  { %v2678_v24 = vpop.eup %2677 }
0x1a3e   :  { %v1978_v27 = vmul.f32 %v2678_v24, %v1872_v11 }
0x1aa1   :  { %v1981_v25 = vpop.permute.xlu0 %1980 }
0x1aa2   :  { %v1983_v26 = vmul.f32 %v2678_v24, %v1981_v25 }
0x1aa4   :  { %1985 = vrot.lane.b32.xlu1 %v1983_v26, %s2716_s22 }
0x1b16   :  { %v1986_v28 = vpop.permute.xlu1 %1985 }
0x1b17   :  { %v1988_v13 = vadd.f32 %v1986_v28, %v1978_v27 }
0x1b19   :  { %2679 = vtanh.f32 %v1988_v13 }
0x1b23   :  { %v2680_v12 = vpop.eup %2679 }
0x1b24   :  { %1991 = vrot.lane.b32.xlu0 %v2680_v12, %s2716_s22 }
0x1b96   :  { %v1992_v29 = vpop.permute.xlu0 %1991 }
0x1b97   :  { %v1994_v30 = vmul.f32 %v2678_v24, %v1992_v29 }
0x1b99   :  { %1996 = vrot.lane.b32.xlu1 %v1994_v30, %s2717_s1 }
0x1c0b   :  { %v1997_v31 = vpop.permute.xlu1 %1996 }
0x1c0c   :  { %2351 = vmatmul.mubr.msk.f32.vlgmr.msra.gmra.mrb[14].mxu0 %vm980_vm2, %v1997_v31 }
0x1c0d   :  { %2565 = vmatpush1.bf16.msra.mxu0 %v2996_v44  ;;  %2290 = vmatprep.mubr.f32.mxu0 %v2712_v2  ;;  %v832_v2 = vadd.f32 %v3008_v49, %v2922_v39 }
0x1cdf   :  { %v2066_v32 = vpop.f32.mrb[14].mxu0 }
0x1ce0   :  { %v2072_v33 = vadd.f32 %v2066_v32, %v3022_v4  ;;  %v2068_v34 = vpop.f32.mrb[15].mxu0 }
0x1ce1   :  { %v2071_v35 = vadd.f32 %v3027_v5, %v2068_v34 }
0x1ce2   :  { %2079 = vrot.lane.b32.xlu0 %v2072_v33, %s2718_s19 }
0x1ce3   :  { %2299 = vst.msk [vmem:[%s3089_s11 + $0x2] sm:$0x3] %vm2297_vm3, %v2071_v35 }
0x1d54   :  { %v2080_v37 = vpop.permute.xlu0 %2079 }
0x1d55   :  { %v2082_v38 = vsel %vm2077_vm5, %v832_v2, %v2080_v37 }
0x1d56   :  { %v2083_v17 = vadd.f32 %v2082_v38, %v2066_v32 }
0x1d58   :  { %2681 = vtanh.f32 %v2083_v17  ;;  %v2353_v41 = vmul.f32 -1.442695, %v2083_v17 }
0x1d5a   :  { %2683 = vpow2.f32 %v2353_v41 }
0x1d62   :  { %v2682_v40 = vpop.eup %2681 }
0x1d63   :  { %2093 = vrot.lane.b32.xlu1 %v2682_v40, %s2715_s21 }
0x1d64   :  { %v2684_v42 = vpop.eup %2683 }
0x1d65   :  { %v2087_v43 = vadd.f32 1.0, %v2684_v42 }
0x1d67   :  { %2685 = vrcp.f32 %v2087_v43 }
0x1d71   :  { %v2686_v44 = vpop.eup %2685 }
0x1d72   :  { %v2091_v47 = vmul.f32 %v2686_v44, %v1988_v13 }
0x1dd5   :  { %v2094_v45 = vpop.permute.xlu1 %2093 }
0x1dd6   :  { %v2096_v46 = vmul.f32 %v2686_v44, %v2094_v45 }
0x1dd8   :  { %2098 = vrot.lane.b32.xlu0 %v2096_v46, %s2716_s22 }
0x1e4a   :  { %v2099_v48 = vpop.permute.xlu0 %2098 }
0x1e4b   :  { %v2101_v39 = vadd.f32 %v2099_v48, %v2091_v47 }
0x1e4d   :  { %2687 = vtanh.f32 %v2101_v39 }
0x1e57   :  { %v2688_v50 = vpop.eup %2687 }
0x1e58   :  { %2104 = vrot.lane.b32.xlu1 %v2688_v50, %s2716_s22 }
0x1eca   :  { %v2105_v51 = vpop.permute.xlu1 %2104 }
0x1ecb   :  { %v2107_v52 = vmul.f32 %v2686_v44, %v2105_v51 }
0x1ecd   :  { %2109 = vrot.lane.b32.xlu0 %v2107_v52, %s2717_s1 }
0x1f3f   :  { %v2110_v53 = vpop.permute.xlu0 %2109 }
0x1f40   :  { %2354 = vmatmul.mubr.msk.f32.vlgmr.msra.gmra.mrb[12].mxu1 %vm980_vm2, %v2110_v53 }
0x2013   :  { %v2179_v54 = vpop.f32.mrb[12].mxu1 }
0x2014   :  { %v2185_v55 = vadd.f32 %v2179_v54, %v3022_v4  ;;  %v2181_v56 = vpop.f32.mrb[13].mxu1 }
0x2015   :  { %v2184_v57 = vadd.f32 %v3027_v5, %v2181_v56 }
0x2016   :  { %2192 = vrot.lane.b32.xlu1 %v2185_v55, %s2718_s19 }
0x2017   :  { %2300 = vst.msk [vmem:[%s3089_s11 + $0x4] sm:$0x3] %vm2297_vm3, %v2184_v57 }
0x2088   :  { %v2193_v60 = vpop.permute.xlu1 %2192 }
0x2089   :  { %v2195_v61 = vsel %vm2190_vm6, %v907_v59, %v2193_v60 }
0x208a   :  { %v2196_v11 = vadd.f32 %v2195_v61, %v2179_v54 }
0x208c   :  { %2689 = vtanh.f32 %v2196_v11  ;;  %v2356_v63 = vmul.f32 -1.442695, %v2196_v11 }
0x208e   :  { %2691 = vpow2.f32 %v2356_v63 }
0x2096   :  { %v2690_v62 = vpop.eup %2689 }
0x2097   :  { %2206 = vrot.lane.b32.xlu0 %v2690_v62, %s2715_s21 }
0x2098   :  { %v2692_v0 = vpop.eup %2691 }
0x2099   :  { %v2200_v1 = vadd.f32 1.0, %v2692_v0 }
0x209b   :  { %2693 = vrcp.f32 %v2200_v1 }
0x20a5   :  { %v2694_v3 = vpop.eup %2693 }
0x20a6   :  { %v2204_v7 = vmul.f32 %v2694_v3, %v2101_v39 }
0x2109   :  { %v2207_v4 = vpop.permute.xlu0 %2206 }
0x210a   :  { %v2209_v6 = vmul.f32 %v2694_v3, %v2207_v4 }
0x210c   :  { %2211 = vrot.lane.b32.xlu1 %v2209_v6, %s2716_s22 }
0x217e   :  { %v2212_v8 = vpop.permute.xlu1 %2211 }
0x217f   :  { %v2214_v15 = vadd.f32 %v2212_v8, %v2204_v7 }
0x2181   :  { %2695 = vtanh.f32 %v2214_v15 }
0x218b   :  { %v2696_v49 = vpop.eup %2695 }
0x218c   :  { %2217 = vrot.lane.b32.xlu0 %v2696_v49, %s2716_s22 }
0x21fe   :  { %v2218_v9 = vpop.permute.xlu0 %2217 }
0x21ff   :  { %v2220_v10 = vmul.f32 %v2694_v3, %v2218_v9 }
0x2201   :  { %2222 = vrot.lane.b32.xlu1 %v2220_v10, %s2717_s1 }
0x2273   :  { %v2223_v14 = vpop.permute.xlu1 %2222 }
0x2274   :  { %2357 = vmatmul.mubr.msk.f32.vlgmr.msra.gmra.mrb[16].mxu0 %vm980_vm2, %v2223_v14 }
0x2347   :  { %v2292_v16 = vpop.f32.mrb[16].mxu0 }
0x2348   :  { %v2293_v18 = vpop.f32.mrb[17].mxu0 }
0x2349   :  { %v2296_v19 = vadd.f32 %v3027_v5, %v2293_v18 }
0x234b   :  { %2301 = vst.msk [vmem:[%s3089_s11 + $0x6] sm:$0x3] %vm2297_vm3, %v2296_v19 }
0x234c   :  { %2306 = vsyncpa [#allocation3], 1 }

</bundles_post_ra>
